<compile_context>
chip_gen: v6e
topology: v6e:2x2x1
jax: 0.10.0
libtpu: 0.0.40
codegen_flags: <defaults>
</compile_context>

<pallas_src>
import functools
import math

import jax
import jax.numpy as jnp
from jax.experimental import pallas as pl
from jax.experimental.pallas import tpu as pltpu


def _round_up(x, m):
    return ((x + m - 1) // m) * m


def _cparams(*sems):
    return pltpu.CompilerParams(dimension_semantics=sems,
                                vmem_limit_bytes=32 * 1024 * 1024)


# ---------------------------------------------------------------------------
# Kernel 1: fused NHWC conv (+bias, +ReLU).
#   The wrapper pre-builds a width-im2col, stride-phase-split, row-flattened
#   input x_flat[b, row*Wo + wo, kj*Cin + c], so the kernel only has to:
#     for each of kh H-taps: take a CONTIGUOUS [Ho*Wo, kw*Cin] slice (static
#     offset along the leading axis) and accumulate ONE matmul with the
#     corresponding [kw*Cin, Cout] weight slab.  K has no zero padding.
#   x_ref : [1, rows*Wo, kw*Cin]   (bf16)
#   w_ref : [kh, kw*Cin, Cout]     (bf16)
#   b_ref : [1, Cout]              (f32)
#   o_ref : [1, Ho*Wo, Cout]
# ---------------------------------------------------------------------------
def _conv_kernel(x_ref, w_ref, b_ref, o_ref, *, taps, Ho, Wo, activation):
    nout = w_ref.shape[-1]
    # f32 accumulator is tiny here (<= [256,16] / [64,32]) -> stays in vregs.
    acc = jnp.zeros((Ho * Wo, nout), jnp.float32)
    for t, off in enumerate(taps):                     # static Python loop (kh taps)
        lhs = x_ref[0, pl.ds(off, Ho * Wo), :]         # [Ho*Wo, kw*Cin], contiguous
        acc = acc + jnp.dot(lhs, w_ref[t], preferred_element_type=jnp.float32)
    acc = acc + b_ref[...]
    if activation == "relu":
        acc = jnp.maximum(acc, 0.0)
    o_ref[0] = acc.astype(o_ref.dtype)


def conv2d(x, w, b, stride=1, pad=1, activation=None, out_dtype=jnp.bfloat16):
    """x: [B,H,W,Cin] (real channels), w: [kh,kw,Cin,Cout], b: [Cout].
    Returns [B,Ho,Wo,Cout] in `out_dtype` (real channels, no lane padding)."""
    kh, kw, cin, cout = w.shape
    B, H, W, cx = x.shape
    assert cx == cin, (cx, cin)
    s = stride
    Ho = (H + 2 * pad - kh) // s + 1
    Wo = (W + 2 * pad - kw) // s + 1
    Hq = Ho + (kh - 1) // s                      # rows needed per stride phase

    # Spatial zero pad (+ extra rows so every stride phase has Hq rows).
    extra_h = max(0, s * Hq - (H + 2 * pad))
    x_p = jnp.pad(x.astype(jnp.bfloat16),
                  ((0, 0), (pad, pad + extra_h), (pad, pad), (0, 0)))

    # Width-only im2col: folds the kw taps AND the W-stride into the lane axis.
    # xw[b, r, wo, kj*Cin + c] = x_p[b, r, wo*s + kj, c]   -> K = kw*Cin (real).
    xw = jnp.concatenate(
        [x_p[:, :, kj: kj + (Wo - 1) * s + 1: s, :] for kj in range(kw)], axis=-1)

    # H-stride phase split (s phases of Hq rows each), then flatten (row, wo)
    # so in-kernel taps are contiguous leading-axis slices (no relayouts).
    if s > 1:
        xw = jnp.concatenate([xw[:, a::s, :, :][:, :Hq] for a in range(s)], axis=1)
    else:
        xw = xw[:, :Hq]
    rows = xw.shape[1]                                       # s * Hq
    x_flat = xw.reshape(B, rows * Wo, kw * cin)

    w2 = w.astype(jnp.bfloat16).reshape(kh, kw * cin, cout)  # per-H-tap weight slabs
    b2 = b.astype(jnp.float32).reshape(1, cout)

    # Static row offset of H-tap ki inside the phase-flattened input.
    taps = tuple((((ki % s) * Hq) + ki // s) * Wo for ki in range(kh))

    out = pl.pallas_call(
        functools.partial(_conv_kernel, taps=taps, Ho=Ho, Wo=Wo,
                          activation=activation),
        out_shape=jax.ShapeDtypeStruct((B, Ho * Wo, cout), out_dtype),
        grid=(B,),
        in_specs=[
            pl.BlockSpec((1, rows * Wo, kw * cin), lambda bi: (bi, 0, 0)),
            pl.BlockSpec((kh, kw * cin, cout), lambda bi: (0, 0, 0)),
            pl.BlockSpec((1, cout), lambda bi: (0, 0)),
        ],
        out_specs=pl.BlockSpec((1, Ho * Wo, cout), lambda bi: (bi, 0, 0)),
        compiler_params=_cparams("parallel"),
    )(x_flat, w2, b2)
    return out.reshape(B, Ho, Wo, cout)


# ---------------------------------------------------------------------------
# Kernel 2: ROI sampling as a one-hot matmul on the MXU.
# TODO(synk): at real feature-map sizes (Ho*Wo ~ 60k) this must become a
# scalar-prefetch / manual-DMA row gather; at HW=64 the MXU one-hot is cheaper.
# ---------------------------------------------------------------------------
def _roi_gather_kernel(sel_ref, feat_ref, o_ref):
    o_ref[0] = jnp.dot(sel_ref[0], feat_ref[0],
                       preferred_element_type=jnp.float32).astype(o_ref.dtype)


def roi_gather(onehot, feat_flat):
    # onehot: [B, R, HW] bf16 ; feat_flat: [B, HW, C] -> [B, R, C] bf16
    B, R, HW = onehot.shape
    C = feat_flat.shape[-1]
    return pl.pallas_call(
        _roi_gather_kernel,
        out_shape=jax.ShapeDtypeStruct((B, R, C), jnp.bfloat16),
        grid=(B,),
        in_specs=[
            pl.BlockSpec((1, R, HW), lambda bi: (bi, 0, 0)),
            pl.BlockSpec((1, HW, C), lambda bi: (bi, 0, 0)),
        ],
        out_specs=pl.BlockSpec((1, R, C), lambda bi: (bi, 0, 0)),
        compiler_params=_cparams("parallel"),
    )(onehot, feat_flat.astype(jnp.bfloat16))


# ---------------------------------------------------------------------------
# Kernel 3: fused box head: fc6 -> ReLU -> fc7 -> ReLU -> [cls | bbox].
# TODO(synk): with realistic proposal counts (~1000) tile M over a parallel
# grid axis (block M = 128 / 256) with resident weights; at M=16 one block wins.
# ---------------------------------------------------------------------------
def _box_head_kernel(x_ref, w6_ref, b6_ref, w7_ref, b7_ref, wp_ref, bp_ref, o_ref):
    h = jnp.dot(x_ref[...], w6_ref[...], preferred_element_type=jnp.float32) + b6_ref[...]
    h = jnp.maximum(h, 0.0).astype(jnp.bfloat16)
    h = jnp.dot(h, w7_ref[...], preferred_element_type=jnp.float32) + b7_ref[...]
    h = jnp.maximum(h, 0.0).astype(jnp.bfloat16)
    o = jnp.dot(h, wp_ref[...], preferred_element_type=jnp.float32) + bp_ref[...]
    o_ref[...] = o.astype(o_ref.dtype)


def fused_box_head(x, w6, b6, w7, b7, wp, bp):
    M = x.shape[0]
    Mp = _round_up(M, 8)
    x = jnp.pad(x, ((0, Mp - M), (0, 0)))
    nout = wp.shape[1]
    args = (x, w6, b6, w7, b7, wp, bp)
    out = pl.pallas_call(
        _box_head_kernel,
        out_shape=jax.ShapeDtypeStruct((Mp, nout), jnp.float32),
        grid=(1,),
        in_specs=[pl.BlockSpec(a.shape, lambda i: (0, 0)) for a in args],
        out_specs=pl.BlockSpec((Mp, nout), lambda i: (0, 0)),
        compiler_params=_cparams("arbitrary"),
    )(*args)
    return out[:M]


# ---------------------------------------------------------------------------
# Detection glue (anchors, box decoding, top-k) — plain JAX
# ---------------------------------------------------------------------------
def make_anchors(Ho, Wo, stride, sizes=(8.0, 16.0, 32.0)):
    ys = (jnp.arange(Ho, dtype=jnp.float32) + 0.5) * stride
    xs = (jnp.arange(Wo, dtype=jnp.float32) + 0.5) * stride
    cy, cx = jnp.meshgrid(ys, xs, indexing="ij")
    per_size = []
    for s in sizes:
        per_size.append(jnp.stack([cx - s / 2, cy - s / 2, cx + s / 2, cy + s / 2], axis=-1))
    a = jnp.stack(per_size, axis=2)            # [Ho, Wo, A, 4]
    return a.reshape(-1, 4)


_DELTA_CLAMP = math.log(1000.0 / 16.0)         # torchvision's bbox_xform_clip


def decode_boxes(boxes, deltas, img_size):
    wa = boxes[..., 2] - boxes[..., 0]
    ha = boxes[..., 3] - boxes[..., 1]
    cxa = boxes[..., 0] + 0.5 * wa
    cya = boxes[..., 1] + 0.5 * ha
    dx, dy, dw, dh = deltas[..., 0], deltas[..., 1], deltas[..., 2], deltas[..., 3]
    cx = dx * wa + cxa
    cy = dy * ha + cya
    w = jnp.exp(jnp.clip(dw, -_DELTA_CLAMP, _DELTA_CLAMP)) * wa
    h = jnp.exp(jnp.clip(dh, -_DELTA_CLAMP, _DELTA_CLAMP)) * ha
    out = jnp.stack([cx - 0.5 * w, cy - 0.5 * h, cx + 0.5 * w, cy + 0.5 * h], axis=-1)
    return jnp.clip(out, 0.0, img_size)


def roi_onehot(boxes, stride, Ho, Wo, out_size):
    # TODO(synk): nearest-neighbour grid sampling, not bilinear ROIAlign.
    x1, y1, x2, y2 = boxes[..., 0], boxes[..., 1], boxes[..., 2], boxes[..., 3]
    g = (jnp.arange(out_size, dtype=jnp.float32) + 0.5) / out_size
    ys = y1[..., None] + g * (y2 - y1)[..., None]          # [B,K,S]
    xs = x1[..., None] + g * (x2 - x1)[..., None]
    iy = jnp.clip(jnp.floor(ys / stride).astype(jnp.int32), 0, Ho - 1)
    ix = jnp.clip(jnp.floor(xs / stride).astype(jnp.int32), 0, Wo - 1)
    flat = iy[:, :, :, None] * Wo + ix[:, :, None, :]      # [B,K,S,S]
    B, K = boxes.shape[0], boxes.shape[1]
    flat = flat.reshape(B, K * out_size * out_size)
    onehot = flat[:, :, None] == jnp.arange(Ho * Wo, dtype=jnp.int32)[None, None, :]
    return onehot.astype(jnp.bfloat16)                     # [B, K*S*S, Ho*Wo]


# ---------------------------------------------------------------------------
# Parameters (deterministic synthetic init)
# ---------------------------------------------------------------------------
def init_params(key, num_classes, hidden=128):
    ks = jax.random.split(key, 9)

    def w(k, shape, scale=0.05):
        return scale * jax.random.normal(k, shape, jnp.float32)

    p = {}
    # TODO(synk): pretrained ResNet50+FPN weights cannot be reproduced in-script;
    # a deterministic 2-conv stem stands in for the backbone.
    p["conv1_w"] = w(ks[0], (3, 3, 3, 16));  p["conv1_b"] = jnp.zeros((16,), jnp.float32)
    p["conv2_w"] = w(ks[1], (3, 3, 16, 32)); p["conv2_b"] = jnp.zeros((32,), jnp.float32)
    # RPN head (3 anchors / location)
    p["rpn_conv_w"] = w(ks[2], (3, 3, 32, 32)); p["rpn_conv_b"] = jnp.zeros((32,), jnp.float32)
    p["rpn_cls_w"] = w(ks[3], (1, 1, 32, 3));   p["rpn_cls_b"] = jnp.zeros((3,), jnp.float32)
    p["rpn_bbox_w"] = w(ks[4], (1, 1, 32, 12)); p["rpn_bbox_b"] = jnp.zeros((12,), jnp.float32)
    # TwoMLPHead (4x4 ROI, 32 ch -> 512 in features) + FastRCNNPredictor
    p["fc6_w"] = w(ks[5], (32 * 4 * 4, hidden)); p["fc6_b"] = jnp.zeros((hidden,), jnp.float32)
    p["fc7_w"] = w(ks[6], (hidden, hidden));     p["fc7_b"] = jnp.zeros((hidden,), jnp.float32)
    p["cls_score_w"] = w(ks[7], (hidden, num_classes))
    p["cls_score_b"] = jnp.zeros((num_classes,), jnp.float32)
    p["bbox_pred_w"] = w(ks[8], (hidden, num_classes * 4))
    p["bbox_pred_b"] = jnp.zeros((num_classes * 4,), jnp.float32)
    return p


# ---------------------------------------------------------------------------
# Forward pass (inference mode: targets=None -> list of {boxes, labels, scores})
# ---------------------------------------------------------------------------
def faster_rcnn_forward(params, images_nchw, num_classes, num_proposals=8, roi_size=4):
    x = jnp.transpose(images_nchw, (0, 2, 3, 1)).astype(jnp.float32)   # NCHW -> NHWC
    B, H, W, _ = x.shape
    img_size = float(H)

    # Backbone (simplified stem; TODO(synk): full ResNet50 + FPN pyramid not reproduced)
    x = conv2d(x, params["conv1_w"], params["conv1_b"], stride=2, pad=1, activation="relu")
    feat = conv2d(x, params["conv2_w"], params["conv2_b"], stride=2, pad=1, activation="relu")
    _, Ho, Wo, C = feat.shape                                  # real channel count (32)
    stride = H // Ho

    # RPN: shared 3x3 conv, then cls + bbox heads fused into one 1x1 conv call.
    # Output stays bf16 at its real 15 channels (3 cls + 12 bbox).
    t = conv2d(feat, params["rpn_conv_w"], params["rpn_conv_b"], 1, 1, "relu")
    A = params["rpn_cls_w"].shape[-1]
    w_head = jnp.concatenate([params["rpn_cls_w"], params["rpn_bbox_w"]], axis=3)
    b_head = jnp.concatenate([params["rpn_cls_b"], params["rpn_bbox_b"]])
    rpn = conv2d(t, w_head, b_head, 1, 0, None)                # [B,Ho,Wo,15] bf16
    rpn = rpn.reshape(B, Ho * Wo, -1)
    obj = rpn[..., :A].reshape(B, -1).astype(jnp.float32)
    deltas = rpn[..., A:A + 4 * A].reshape(B, Ho * Wo * A, 4).astype(jnp.float32)

    anchors = make_anchors(Ho, Wo, stride)                       # [Ho*Wo*A, 4]
    proposals_all = decode_boxes(anchors[None], deltas, img_size)

    # Top-K proposals by objectness.  TODO(synk): NMS has no clean Pallas equivalent; skipped.
    _, idx = jax.lax.top_k(jax.nn.sigmoid(obj), num_proposals)
    gidx = jnp.broadcast_to(idx[..., None], (B, num_proposals, 4))
    proposals = jnp.take_along_axis(proposals_all, gidx, axis=1)          # [B, K, 4]

    # ROI features: one-hot selection matrix, gathered on the MXU.
    onehot = roi_onehot(proposals, stride, Ho, Wo, roi_size)              # [B, K*S*S, Ho*Wo]
    feat_flat = feat.reshape(B, Ho * Wo, C)
    sampled = roi_gather(onehot, feat_flat)                               # [B, K*S*S, C]
    roi_feats = sampled.reshape(B * num_proposals, roi_size * roi_size * C)

    # Fused TwoMLPHead + FastRCNNPredictor (single Pallas kernel, no padding
    # plumbing: 512 / 128 are already MXU-friendly, output keeps its real 25 cols).
    wp = jnp.concatenate([params["cls_score_w"], params["bbox_pred_w"]], axis=1)
    bp = jnp.concatenate([params["cls_score_b"], params["bbox_pred_b"]]).reshape(1, -1)
    head = fused_box_head(roi_feats.astype(jnp.bfloat16),
                          params["fc6_w"].astype(jnp.bfloat16),
                          params["fc6_b"].astype(jnp.float32).reshape(1, -1),
                          params["fc7_w"].astype(jnp.bfloat16),
                          params["fc7_b"].astype(jnp.float32).reshape(1, -1),
                          wp.astype(jnp.bfloat16), bp.astype(jnp.float32))
    cls_logits = head[:, :num_classes]
    box_deltas = head[:, num_classes:num_classes * 5].reshape(-1, num_classes, 4)

    # Post-processing (class 0 = background, like torchvision)
    probs = jax.nn.softmax(cls_logits, axis=-1)
    fg = probs[:, 1:]
    labels = jnp.argmax(fg, axis=-1) + 1
    det_scores = jnp.max(fg, axis=-1)
    sel = jnp.broadcast_to(labels[:, None, None], (labels.shape[0], 1, 4))
    sel_deltas = jnp.take_along_axis(box_deltas, sel, axis=1)[:, 0]
    boxes = decode_boxes(proposals.reshape(-1, 4), sel_deltas, img_size)

    boxes = boxes.reshape(B, num_proposals, 4)
    labels = labels.reshape(B, num_proposals)
    det_scores = det_scores.reshape(B, num_proposals)
    return [{"boxes": boxes[i], "labels": labels[i], "scores": det_scores[i]}
            for i in range(B)]


if __name__ == "__main__":
    num_classes = 5
    key = jax.random.PRNGKey(0)
    pkey, ikey = jax.random.split(key)
    params = init_params(pkey, num_classes)
    images = jax.random.uniform(ikey, (2, 3, 32, 32), jnp.float32)   # NCHW like PyTorch
    fwd = jax.jit(functools.partial(faster_rcnn_forward, num_classes=num_classes))
    preds = fwd(params, images)
    for p in preds:
        jax.block_until_ready(p["boxes"])
        jax.block_until_ready(p["labels"])
        jax.block_until_ready(p["scores"])
    print("KERNEL_OK")
</pallas_src>

<mosaic_0001>
module attributes {stable_mosaic.version = 11 : i64} {
  func.func @_conv_kernel(%arg0: i32, %arg1: memref<1x544x9xbf16, #tpu.memory_space<vmem>>, %arg2: memref<3x9x16xbf16, #tpu.memory_space<vmem>>, %arg3: memref<1x16xf32, #tpu.memory_space<vmem>>, %arg4: memref<1x256x16xbf16, #tpu.memory_space<vmem>>) attributes {dimension_semantics = [#tpu.dimension_semantics<parallel>], iteration_bounds = array<i64: 2>, scalar_prefetch = 0 : i64, scratch_operands = 0 : i64, tpu.core_type = #tpu.core_type<tc>, window_params = [{transform_indices = @transform_0, window_bounds = array<i64: 1, 544, 9>}, {pipeline_mode = #tpu.pipeline_mode<synchronous>, transform_indices = @transform_1, window_bounds = array<i64: 3, 9, 16>}, {pipeline_mode = #tpu.pipeline_mode<synchronous>, transform_indices = @transform_2, window_bounds = array<i64: 1, 16>}, {transform_indices = @transform_3, window_bounds = array<i64: 1, 256, 16>}]} {
    %cst = arith.constant 0.000000e+00 : f32
    %0 = vector.broadcast %cst : f32 to vector<256x16xf32>
    %c0 = arith.constant 0 : index
    %c0_0 = arith.constant 0 : index
    %c0_1 = arith.constant 0 : index
    %1 = vector.load %arg1[%c0, %c0_0, %c0_1] : memref<1x544x9xbf16, #tpu.memory_space<vmem>>, vector<1x256x9xbf16>
    %2 = vector.shape_cast %1 : vector<1x256x9xbf16> to vector<256x9xbf16>
    %c0_2 = arith.constant 0 : index
    %c0_3 = arith.constant 0 : index
    %c0_4 = arith.constant 0 : index
    %3 = vector.load %arg2[%c0_2, %c0_3, %c0_4] : memref<3x9x16xbf16, #tpu.memory_space<vmem>>, vector<1x9x16xbf16>
    %4 = vector.shape_cast %3 : vector<1x9x16xbf16> to vector<9x16xbf16>
    %cst_5 = arith.constant dense<0.000000e+00> : vector<256x16xf32>
    %5 = tpu.matmul %2, %4, %cst_5 {dimension_numbers = #tpu.dot_dimension_numbers<[1], [0], [0], [1], [0, 0, 1, 1], [], []>} : vector<256x9xbf16>, vector<9x16xbf16>, vector<256x16xf32> -> vector<256x16xf32>
    %6 = arith.addf %0, %5 : vector<256x16xf32>
    %c0_6 = arith.constant 0 : index
    %c272 = arith.constant 272 : index
    %c0_7 = arith.constant 0 : index
    %7 = vector.load %arg1[%c0_6, %c272, %c0_7] : memref<1x544x9xbf16, #tpu.memory_space<vmem>>, vector<1x256x9xbf16>
    %8 = vector.shape_cast %7 : vector<1x256x9xbf16> to vector<256x9xbf16>
    %c1 = arith.constant 1 : index
    %c0_8 = arith.constant 0 : index
    %c0_9 = arith.constant 0 : index
    %9 = vector.load %arg2[%c1, %c0_8, %c0_9] : memref<3x9x16xbf16, #tpu.memory_space<vmem>>, vector<1x9x16xbf16>
    %10 = vector.shape_cast %9 : vector<1x9x16xbf16> to vector<9x16xbf16>
    %cst_10 = arith.constant dense<0.000000e+00> : vector<256x16xf32>
    %11 = tpu.matmul %8, %10, %cst_10 {dimension_numbers = #tpu.dot_dimension_numbers<[1], [0], [0], [1], [0, 0, 1, 1], [], []>} : vector<256x9xbf16>, vector<9x16xbf16>, vector<256x16xf32> -> vector<256x16xf32>
    %12 = arith.addf %6, %11 : vector<256x16xf32>
    %c0_11 = arith.constant 0 : index
    %c16 = arith.constant 16 : index
    %c0_12 = arith.constant 0 : index
    %13 = vector.load %arg1[%c0_11, %c16, %c0_12] : memref<1x544x9xbf16, #tpu.memory_space<vmem>>, vector<1x256x9xbf16>
    %14 = vector.shape_cast %13 : vector<1x256x9xbf16> to vector<256x9xbf16>
    %c2 = arith.constant 2 : index
    %c0_13 = arith.constant 0 : index
    %c0_14 = arith.constant 0 : index
    %15 = vector.load %arg2[%c2, %c0_13, %c0_14] : memref<3x9x16xbf16, #tpu.memory_space<vmem>>, vector<1x9x16xbf16>
    %16 = vector.shape_cast %15 : vector<1x9x16xbf16> to vector<9x16xbf16>
    %cst_15 = arith.constant dense<0.000000e+00> : vector<256x16xf32>
    %17 = tpu.matmul %14, %16, %cst_15 {dimension_numbers = #tpu.dot_dimension_numbers<[1], [0], [0], [1], [0, 0, 1, 1], [], []>} : vector<256x9xbf16>, vector<9x16xbf16>, vector<256x16xf32> -> vector<256x16xf32>
    %18 = arith.addf %12, %17 : vector<256x16xf32>
    %c0_16 = arith.constant 0 : index
    %c0_17 = arith.constant 0 : index
    %19 = vector.load %arg3[%c0_16, %c0_17] : memref<1x16xf32, #tpu.memory_space<vmem>>, vector<1x16xf32>
    %20 = vector.broadcast %19 : vector<1x16xf32> to vector<256x16xf32>
    %21 = arith.addf %18, %20 : vector<256x16xf32>
    %cst_18 = arith.constant 0.000000e+00 : f32
    %22 = vector.broadcast %cst_18 : f32 to vector<256x16xf32>
    %23 = arith.maximumf %21, %22 : vector<256x16xf32>
    %24 = arith.truncf %23 : vector<256x16xf32> to vector<256x16xbf16>
    %c0_19 = arith.constant 0 : index
    %c0_20 = arith.constant 0 : index
    %c0_21 = arith.constant 0 : index
    %25 = vector.load %arg4[%c0_19, %c0_20, %c0_21] : memref<1x256x16xbf16, #tpu.memory_space<vmem>>, vector<1x256x16xbf16>
    %26 = vector.shape_cast %25 : vector<1x256x16xbf16> to vector<256x16xbf16>
    %27 = vector.shape_cast %24 : vector<256x16xbf16> to vector<1x256x16xbf16>
    tpu.vector_store %arg4[%c0_19, %c0_20, %c0_21], %27 {strides = array<i32>} : memref<1x256x16xbf16, #tpu.memory_space<vmem>>, vector<1x256x16xbf16>,
    return
  }
  func.func @transform_0(%arg0: i32) -> (i32, i32, i32) {
    %c0_i32 = arith.constant 0 : i32
    %c0_i32_0 = arith.constant 0 : i32
    %c0_i32_1 = arith.constant 0 : i32
    return %arg0, %c0_i32, %c0_i32_0 : i32, i32, i32
  }
  func.func @transform_1(%arg0: i32) -> (i32, i32, i32) {
    %c0_i32 = arith.constant 0 : i32
    %c0_i32_0 = arith.constant 0 : i32
    %c0_i32_1 = arith.constant 0 : i32
    %c0_i32_2 = arith.constant 0 : i32
    return %c0_i32, %c0_i32_0, %c0_i32_1 : i32, i32, i32
  }
  func.func @transform_2(%arg0: i32) -> (i32, i32) {
    %c0_i32 = arith.constant 0 : i32
    %c0_i32_0 = arith.constant 0 : i32
    %c0_i32_1 = arith.constant 0 : i32
    return %c0_i32, %c0_i32_0 : i32, i32
  }
  func.func @transform_3(%arg0: i32) -> (i32, i32, i32) {
    %c0_i32 = arith.constant 0 : i32
    %c0_i32_0 = arith.constant 0 : i32
    %c0_i32_1 = arith.constant 0 : i32
    return %arg0, %c0_i32, %c0_i32_0 : i32, i32, i32
  }
}

module attributes {stable_mosaic.version = 11 : i64} {
  func.func @_conv_kernel(%arg0: i32, %arg1: memref<1x144x48xbf16, #tpu.memory_space<vmem>>, %arg2: memref<3x48x32xbf16, #tpu.memory_space<vmem>>, %arg3: memref<1x32xf32, #tpu.memory_space<vmem>>, %arg4: memref<1x64x32xbf16, #tpu.memory_space<vmem>>) attributes {dimension_semantics = [#tpu.dimension_semantics<parallel>], iteration_bounds = array<i64: 2>, scalar_prefetch = 0 : i64, scratch_operands = 0 : i64, tpu.core_type = #tpu.core_type<tc>, window_params = [{transform_indices = @transform_0, window_bounds = array<i64: 1, 144, 48>}, {pipeline_mode = #tpu.pipeline_mode<synchronous>, transform_indices = @transform_1, window_bounds = array<i64: 3, 48, 32>}, {pipeline_mode = #tpu.pipeline_mode<synchronous>, transform_indices = @transform_2, window_bounds = array<i64: 1, 32>}, {transform_indices = @transform_3, window_bounds = array<i64: 1, 64, 32>}]} {
    %cst = arith.constant 0.000000e+00 : f32
    %0 = vector.broadcast %cst : f32 to vector<64x32xf32>
    %c0 = arith.constant 0 : index
    %c0_0 = arith.constant 0 : index
    %c0_1 = arith.constant 0 : index
    %1 = vector.load %arg1[%c0, %c0_0, %c0_1] : memref<1x144x48xbf16, #tpu.memory_space<vmem>>, vector<1x64x48xbf16>
    %2 = vector.shape_cast %1 : vector<1x64x48xbf16> to vector<64x48xbf16>
    %c0_2 = arith.constant 0 : index
    %c0_3 = arith.constant 0 : index
    %c0_4 = arith.constant 0 : index
    %3 = vector.load %arg2[%c0_2, %c0_3, %c0_4] : memref<3x48x32xbf16, #tpu.memory_space<vmem>>, vector<1x48x32xbf16>
    %4 = vector.shape_cast %3 : vector<1x48x32xbf16> to vector<48x32xbf16>
    %cst_5 = arith.constant dense<0.000000e+00> : vector<64x32xf32>
    %5 = tpu.matmul %2, %4, %cst_5 {dimension_numbers = #tpu.dot_dimension_numbers<[1], [0], [0], [1], [0, 0, 1, 1], [], []>} : vector<64x48xbf16>, vector<48x32xbf16>, vector<64x32xf32> -> vector<64x32xf32>
    %6 = arith.addf %0, %5 : vector<64x32xf32>
    %c0_6 = arith.constant 0 : index
    %c72 = arith.constant 72 : index
    %c0_7 = arith.constant 0 : index
    %7 = vector.load %arg1[%c0_6, %c72, %c0_7] : memref<1x144x48xbf16, #tpu.memory_space<vmem>>, vector<1x64x48xbf16>
    %8 = vector.shape_cast %7 : vector<1x64x48xbf16> to vector<64x48xbf16>
    %c1 = arith.constant 1 : index
    %c0_8 = arith.constant 0 : index
    %c0_9 = arith.constant 0 : index
    %9 = vector.load %arg2[%c1, %c0_8, %c0_9] : memref<3x48x32xbf16, #tpu.memory_space<vmem>>, vector<1x48x32xbf16>
    %10 = vector.shape_cast %9 : vector<1x48x32xbf16> to vector<48x32xbf16>
    %cst_10 = arith.constant dense<0.000000e+00> : vector<64x32xf32>
    %11 = tpu.matmul %8, %10, %cst_10 {dimension_numbers = #tpu.dot_dimension_numbers<[1], [0], [0], [1], [0, 0, 1, 1], [], []>} : vector<64x48xbf16>, vector<48x32xbf16>, vector<64x32xf32> -> vector<64x32xf32>
    %12 = arith.addf %6, %11 : vector<64x32xf32>
    %c0_11 = arith.constant 0 : index
    %c8 = arith.constant 8 : index
    %c0_12 = arith.constant 0 : index
    %13 = vector.load %arg1[%c0_11, %c8, %c0_12] : memref<1x144x48xbf16, #tpu.memory_space<vmem>>, vector<1x64x48xbf16>
    %14 = vector.shape_cast %13 : vector<1x64x48xbf16> to vector<64x48xbf16>
    %c2 = arith.constant 2 : index
    %c0_13 = arith.constant 0 : index
    %c0_14 = arith.constant 0 : index
    %15 = vector.load %arg2[%c2, %c0_13, %c0_14] : memref<3x48x32xbf16, #tpu.memory_space<vmem>>, vector<1x48x32xbf16>
    %16 = vector.shape_cast %15 : vector<1x48x32xbf16> to vector<48x32xbf16>
    %cst_15 = arith.constant dense<0.000000e+00> : vector<64x32xf32>
    %17 = tpu.matmul %14, %16, %cst_15 {dimension_numbers = #tpu.dot_dimension_numbers<[1], [0], [0], [1], [0, 0, 1, 1], [], []>} : vector<64x48xbf16>, vector<48x32xbf16>, vector<64x32xf32> -> vector<64x32xf32>
    %18 = arith.addf %12, %17 : vector<64x32xf32>
    %c0_16 = arith.constant 0 : index
    %c0_17 = arith.constant 0 : index
    %19 = vector.load %arg3[%c0_16, %c0_17] : memref<1x32xf32, #tpu.memory_space<vmem>>, vector<1x32xf32>
    %20 = vector.broadcast %19 : vector<1x32xf32> to vector<64x32xf32>
    %21 = arith.addf %18, %20 : vector<64x32xf32>
    %cst_18 = arith.constant 0.000000e+00 : f32
    %22 = vector.broadcast %cst_18 : f32 to vector<64x32xf32>
    %23 = arith.maximumf %21, %22 : vector<64x32xf32>
    %24 = arith.truncf %23 : vector<64x32xf32> to vector<64x32xbf16>
    %c0_19 = arith.constant 0 : index
    %c0_20 = arith.constant 0 : index
    %c0_21 = arith.constant 0 : index
    %25 = vector.load %arg4[%c0_19, %c0_20, %c0_21] : memref<1x64x32xbf16, #tpu.memory_space<vmem>>, vector<1x64x32xbf16>
    %26 = vector.shape_cast %25 : vector<1x64x32xbf16> to vector<64x32xbf16>
    %27 = vector.shape_cast %24 : vector<64x32xbf16> to vector<1x64x32xbf16>
    tpu.vector_store %arg4[%c0_19, %c0_20, %c0_21], %27 {strides = array<i32>} : memref<1x64x32xbf16, #tpu.memory_space<vmem>>, vector<1x64x32xbf16>,
    return
  }
  func.func @transform_0(%arg0: i32) -> (i32, i32, i32) {
    %c0_i32 = arith.constant 0 : i32
    %c0_i32_0 = arith.constant 0 : i32
    %c0_i32_1 = arith.constant 0 : i32
    return %arg0, %c0_i32, %c0_i32_0 : i32, i32, i32
  }
  func.func @transform_1(%arg0: i32) -> (i32, i32, i32) {
    %c0_i32 = arith.constant 0 : i32
    %c0_i32_0 = arith.constant 0 : i32
    %c0_i32_1 = arith.constant 0 : i32
    %c0_i32_2 = arith.constant 0 : i32
    return %c0_i32, %c0_i32_0, %c0_i32_1 : i32, i32, i32
  }
  func.func @transform_2(%arg0: i32) -> (i32, i32) {
    %c0_i32 = arith.constant 0 : i32
    %c0_i32_0 = arith.constant 0 : i32
    %c0_i32_1 = arith.constant 0 : i32
    return %c0_i32, %c0_i32_0 : i32, i32
  }
  func.func @transform_3(%arg0: i32) -> (i32, i32, i32) {
    %c0_i32 = arith.constant 0 : i32
    %c0_i32_0 = arith.constant 0 : i32
    %c0_i32_1 = arith.constant 0 : i32
    return %arg0, %c0_i32, %c0_i32_0 : i32, i32, i32
  }
}

module attributes {stable_mosaic.version = 11 : i64} {
  func.func @_conv_kernel(%arg0: i32, %arg1: memref<1x80x96xbf16, #tpu.memory_space<vmem>>, %arg2: memref<3x96x32xbf16, #tpu.memory_space<vmem>>, %arg3: memref<1x32xf32, #tpu.memory_space<vmem>>, %arg4: memref<1x64x32xbf16, #tpu.memory_space<vmem>>) attributes {dimension_semantics = [#tpu.dimension_semantics<parallel>], iteration_bounds = array<i64: 2>, scalar_prefetch = 0 : i64, scratch_operands = 0 : i64, tpu.core_type = #tpu.core_type<tc>, window_params = [{transform_indices = @transform_0, window_bounds = array<i64: 1, 80, 96>}, {pipeline_mode = #tpu.pipeline_mode<synchronous>, transform_indices = @transform_1, window_bounds = array<i64: 3, 96, 32>}, {pipeline_mode = #tpu.pipeline_mode<synchronous>, transform_indices = @transform_2, window_bounds = array<i64: 1, 32>}, {transform_indices = @transform_3, window_bounds = array<i64: 1, 64, 32>}]} {
    %cst = arith.constant 0.000000e+00 : f32
    %0 = vector.broadcast %cst : f32 to vector<64x32xf32>
    %c0 = arith.constant 0 : index
    %c0_0 = arith.constant 0 : index
    %c0_1 = arith.constant 0 : index
    %1 = vector.load %arg1[%c0, %c0_0, %c0_1] : memref<1x80x96xbf16, #tpu.memory_space<vmem>>, vector<1x64x96xbf16>
    %2 = vector.shape_cast %1 : vector<1x64x96xbf16> to vector<64x96xbf16>
    %c0_2 = arith.constant 0 : index
    %c0_3 = arith.constant 0 : index
    %c0_4 = arith.constant 0 : index
    %3 = vector.load %arg2[%c0_2, %c0_3, %c0_4] : memref<3x96x32xbf16, #tpu.memory_space<vmem>>, vector<1x96x32xbf16>
    %4 = vector.shape_cast %3 : vector<1x96x32xbf16> to vector<96x32xbf16>
    %cst_5 = arith.constant dense<0.000000e+00> : vector<64x32xf32>
    %5 = tpu.matmul %2, %4, %cst_5 {dimension_numbers = #tpu.dot_dimension_numbers<[1], [0], [0], [1], [0, 0, 1, 1], [], []>} : vector<64x96xbf16>, vector<96x32xbf16>, vector<64x32xf32> -> vector<64x32xf32>
    %6 = arith.addf %0, %5 : vector<64x32xf32>
    %c0_6 = arith.constant 0 : index
    %c8 = arith.constant 8 : index
    %c0_7 = arith.constant 0 : index
    %7 = vector.load %arg1[%c0_6, %c8, %c0_7] : memref<1x80x96xbf16, #tpu.memory_space<vmem>>, vector<1x64x96xbf16>
    %8 = vector.shape_cast %7 : vector<1x64x96xbf16> to vector<64x96xbf16>
    %c1 = arith.constant 1 : index
    %c0_8 = arith.constant 0 : index
    %c0_9 = arith.constant 0 : index
    %9 = vector.load %arg2[%c1, %c0_8, %c0_9] : memref<3x96x32xbf16, #tpu.memory_space<vmem>>, vector<1x96x32xbf16>
    %10 = vector.shape_cast %9 : vector<1x96x32xbf16> to vector<96x32xbf16>
    %cst_10 = arith.constant dense<0.000000e+00> : vector<64x32xf32>
    %11 = tpu.matmul %8, %10, %cst_10 {dimension_numbers = #tpu.dot_dimension_numbers<[1], [0], [0], [1], [0, 0, 1, 1], [], []>} : vector<64x96xbf16>, vector<96x32xbf16>, vector<64x32xf32> -> vector<64x32xf32>
    %12 = arith.addf %6, %11 : vector<64x32xf32>
    %c0_11 = arith.constant 0 : index
    %c16 = arith.constant 16 : index
    %c0_12 = arith.constant 0 : index
    %13 = vector.load %arg1[%c0_11, %c16, %c0_12] : memref<1x80x96xbf16, #tpu.memory_space<vmem>>, vector<1x64x96xbf16>
    %14 = vector.shape_cast %13 : vector<1x64x96xbf16> to vector<64x96xbf16>
    %c2 = arith.constant 2 : index
    %c0_13 = arith.constant 0 : index
    %c0_14 = arith.constant 0 : index
    %15 = vector.load %arg2[%c2, %c0_13, %c0_14] : memref<3x96x32xbf16, #tpu.memory_space<vmem>>, vector<1x96x32xbf16>
    %16 = vector.shape_cast %15 : vector<1x96x32xbf16> to vector<96x32xbf16>
    %cst_15 = arith.constant dense<0.000000e+00> : vector<64x32xf32>
    %17 = tpu.matmul %14, %16, %cst_15 {dimension_numbers = #tpu.dot_dimension_numbers<[1], [0], [0], [1], [0, 0, 1, 1], [], []>} : vector<64x96xbf16>, vector<96x32xbf16>, vector<64x32xf32> -> vector<64x32xf32>
    %18 = arith.addf %12, %17 : vector<64x32xf32>
    %c0_16 = arith.constant 0 : index
    %c0_17 = arith.constant 0 : index
    %19 = vector.load %arg3[%c0_16, %c0_17] : memref<1x32xf32, #tpu.memory_space<vmem>>, vector<1x32xf32>
    %20 = vector.broadcast %19 : vector<1x32xf32> to vector<64x32xf32>
    %21 = arith.addf %18, %20 : vector<64x32xf32>
    %cst_18 = arith.constant 0.000000e+00 : f32
    %22 = vector.broadcast %cst_18 : f32 to vector<64x32xf32>
    %23 = arith.maximumf %21, %22 : vector<64x32xf32>
    %24 = arith.truncf %23 : vector<64x32xf32> to vector<64x32xbf16>
    %c0_19 = arith.constant 0 : index
    %c0_20 = arith.constant 0 : index
    %c0_21 = arith.constant 0 : index
    %25 = vector.load %arg4[%c0_19, %c0_20, %c0_21] : memref<1x64x32xbf16, #tpu.memory_space<vmem>>, vector<1x64x32xbf16>
    %26 = vector.shape_cast %25 : vector<1x64x32xbf16> to vector<64x32xbf16>
    %27 = vector.shape_cast %24 : vector<64x32xbf16> to vector<1x64x32xbf16>
    tpu.vector_store %arg4[%c0_19, %c0_20, %c0_21], %27 {strides = array<i32>} : memref<1x64x32xbf16, #tpu.memory_space<vmem>>, vector<1x64x32xbf16>,
    return
  }
  func.func @transform_0(%arg0: i32) -> (i32, i32, i32) {
    %c0_i32 = arith.constant 0 : i32
    %c0_i32_0 = arith.constant 0 : i32
    %c0_i32_1 = arith.constant 0 : i32
    return %arg0, %c0_i32, %c0_i32_0 : i32, i32, i32
  }
  func.func @transform_1(%arg0: i32) -> (i32, i32, i32) {
    %c0_i32 = arith.constant 0 : i32
    %c0_i32_0 = arith.constant 0 : i32
    %c0_i32_1 = arith.constant 0 : i32
    %c0_i32_2 = arith.constant 0 : i32
    return %c0_i32, %c0_i32_0, %c0_i32_1 : i32, i32, i32
  }
  func.func @transform_2(%arg0: i32) -> (i32, i32) {
    %c0_i32 = arith.constant 0 : i32
    %c0_i32_0 = arith.constant 0 : i32
    %c0_i32_1 = arith.constant 0 : i32
    return %c0_i32, %c0_i32_0 : i32, i32
  }
  func.func @transform_3(%arg0: i32) -> (i32, i32, i32) {
    %c0_i32 = arith.constant 0 : i32
    %c0_i32_0 = arith.constant 0 : i32
    %c0_i32_1 = arith.constant 0 : i32
    return %arg0, %c0_i32, %c0_i32_0 : i32, i32, i32
  }
}

module attributes {stable_mosaic.version = 11 : i64} {
  func.func @_conv_kernel(%arg0: i32, %arg1: memref<1x64x32xbf16, #tpu.memory_space<vmem>>, %arg2: memref<1x32x15xbf16, #tpu.memory_space<vmem>>, %arg3: memref<1x15xf32, #tpu.memory_space<vmem>>, %arg4: memref<1x64x15xbf16, #tpu.memory_space<vmem>>) attributes {dimension_semantics = [#tpu.dimension_semantics<parallel>], iteration_bounds = array<i64: 2>, scalar_prefetch = 0 : i64, scratch_operands = 0 : i64, tpu.core_type = #tpu.core_type<tc>, window_params = [{transform_indices = @transform_0, window_bounds = array<i64: 1, 64, 32>}, {pipeline_mode = #tpu.pipeline_mode<synchronous>, transform_indices = @transform_1, window_bounds = array<i64: 1, 32, 15>}, {pipeline_mode = #tpu.pipeline_mode<synchronous>, transform_indices = @transform_2, window_bounds = array<i64: 1, 15>}, {transform_indices = @transform_3, window_bounds = array<i64: 1, 64, 15>}]} {
    %cst = arith.constant 0.000000e+00 : f32
    %0 = vector.broadcast %cst : f32 to vector<64x15xf32>
    %c0 = arith.constant 0 : index
    %c0_0 = arith.constant 0 : index
    %c0_1 = arith.constant 0 : index
    %1 = vector.load %arg1[%c0, %c0_0, %c0_1] : memref<1x64x32xbf16, #tpu.memory_space<vmem>>, vector<1x64x32xbf16>
    %2 = vector.shape_cast %1 : vector<1x64x32xbf16> to vector<64x32xbf16>
    %c0_2 = arith.constant 0 : index
    %c0_3 = arith.constant 0 : index
    %c0_4 = arith.constant 0 : index
    %3 = vector.load %arg2[%c0_2, %c0_3, %c0_4] : memref<1x32x15xbf16, #tpu.memory_space<vmem>>, vector<1x32x15xbf16>
    %4 = vector.shape_cast %3 : vector<1x32x15xbf16> to vector<32x15xbf16>
    %cst_5 = arith.constant dense<0.000000e+00> : vector<64x15xf32>
    %5 = tpu.matmul %2, %4, %cst_5 {dimension_numbers = #tpu.dot_dimension_numbers<[1], [0], [0], [1], [0, 0, 1, 1], [], []>} : vector<64x32xbf16>, vector<32x15xbf16>, vector<64x15xf32> -> vector<64x15xf32>
    %6 = arith.addf %0, %5 : vector<64x15xf32>
    %c0_6 = arith.constant 0 : index
    %c0_7 = arith.constant 0 : index
    %7 = vector.load %arg3[%c0_6, %c0_7] : memref<1x15xf32, #tpu.memory_space<vmem>>, vector<1x15xf32>
    %8 = vector.broadcast %7 : vector<1x15xf32> to vector<64x15xf32>
    %9 = arith.addf %6, %8 : vector<64x15xf32>
    %10 = arith.truncf %9 : vector<64x15xf32> to vector<64x15xbf16>
    %c0_8 = arith.constant 0 : index
    %c0_9 = arith.constant 0 : index
    %c0_10 = arith.constant 0 : index
    %11 = vector.load %arg4[%c0_8, %c0_9, %c0_10] : memref<1x64x15xbf16, #tpu.memory_space<vmem>>, vector<1x64x15xbf16>
    %12 = vector.shape_cast %11 : vector<1x64x15xbf16> to vector<64x15xbf16>
    %13 = vector.shape_cast %10 : vector<64x15xbf16> to vector<1x64x15xbf16>
    tpu.vector_store %arg4[%c0_8, %c0_9, %c0_10], %13 {strides = array<i32>} : memref<1x64x15xbf16, #tpu.memory_space<vmem>>, vector<1x64x15xbf16>,
    return
  }
  func.func @transform_0(%arg0: i32) -> (i32, i32, i32) {
    %c0_i32 = arith.constant 0 : i32
    %c0_i32_0 = arith.constant 0 : i32
    %c0_i32_1 = arith.constant 0 : i32
    return %arg0, %c0_i32, %c0_i32_0 : i32, i32, i32
  }
  func.func @transform_1(%arg0: i32) -> (i32, i32, i32) {
    %c0_i32 = arith.constant 0 : i32
    %c0_i32_0 = arith.constant 0 : i32
    %c0_i32_1 = arith.constant 0 : i32
    %c0_i32_2 = arith.constant 0 : i32
    return %c0_i32, %c0_i32_0, %c0_i32_1 : i32, i32, i32
  }
  func.func @transform_2(%arg0: i32) -> (i32, i32) {
    %c0_i32 = arith.constant 0 : i32
    %c0_i32_0 = arith.constant 0 : i32
    %c0_i32_1 = arith.constant 0 : i32
    return %c0_i32, %c0_i32_0 : i32, i32
  }
  func.func @transform_3(%arg0: i32) -> (i32, i32, i32) {
    %c0_i32 = arith.constant 0 : i32
    %c0_i32_0 = arith.constant 0 : i32
    %c0_i32_1 = arith.constant 0 : i32
    return %arg0, %c0_i32, %c0_i32_0 : i32, i32, i32
  }
}

module attributes {stable_mosaic.version = 11 : i64} {
  func.func @_roi_gather_kernel(%arg0: i32, %arg1: memref<1x128x64xbf16, #tpu.memory_space<vmem>>, %arg2: memref<1x64x32xbf16, #tpu.memory_space<vmem>>, %arg3: memref<1x128x32xbf16, #tpu.memory_space<vmem>>) attributes {dimension_semantics = [#tpu.dimension_semantics<parallel>], iteration_bounds = array<i64: 2>, scalar_prefetch = 0 : i64, scratch_operands = 0 : i64, tpu.core_type = #tpu.core_type<tc>, window_params = [{transform_indices = @transform_0, window_bounds = array<i64: 1, 128, 64>}, {transform_indices = @transform_1, window_bounds = array<i64: 1, 64, 32>}, {transform_indices = @transform_2, window_bounds = array<i64: 1, 128, 32>}]} {
    %c0 = arith.constant 0 : index
    %c0_0 = arith.constant 0 : index
    %c0_1 = arith.constant 0 : index
    %0 = vector.load %arg1[%c0, %c0_0, %c0_1] : memref<1x128x64xbf16, #tpu.memory_space<vmem>>, vector<1x128x64xbf16>
    %1 = vector.shape_cast %0 : vector<1x128x64xbf16> to vector<128x64xbf16>
    %c0_2 = arith.constant 0 : index
    %c0_3 = arith.constant 0 : index
    %c0_4 = arith.constant 0 : index
    %2 = vector.load %arg2[%c0_2, %c0_3, %c0_4] : memref<1x64x32xbf16, #tpu.memory_space<vmem>>, vector<1x64x32xbf16>
    %3 = vector.shape_cast %2 : vector<1x64x32xbf16> to vector<64x32xbf16>
    %cst = arith.constant dense<0.000000e+00> : vector<128x32xf32>
    %4 = tpu.matmul %1, %3, %cst {dimension_numbers = #tpu.dot_dimension_numbers<[1], [0], [0], [1], [0, 0, 1, 1], [], []>} : vector<128x64xbf16>, vector<64x32xbf16>, vector<128x32xf32> -> vector<128x32xf32>
    %5 = arith.truncf %4 : vector<128x32xf32> to vector<128x32xbf16>
    %c0_5 = arith.constant 0 : index
    %c0_6 = arith.constant 0 : index
    %c0_7 = arith.constant 0 : index
    %6 = vector.load %arg3[%c0_5, %c0_6, %c0_7] : memref<1x128x32xbf16, #tpu.memory_space<vmem>>, vector<1x128x32xbf16>
    %7 = vector.shape_cast %6 : vector<1x128x32xbf16> to vector<128x32xbf16>
    %8 = vector.shape_cast %5 : vector<128x32xbf16> to vector<1x128x32xbf16>
    tpu.vector_store %arg3[%c0_5, %c0_6, %c0_7], %8 {strides = array<i32>} : memref<1x128x32xbf16, #tpu.memory_space<vmem>>, vector<1x128x32xbf16>,
    return
  }
  func.func @transform_0(%arg0: i32) -> (i32, i32, i32) {
    %c0_i32 = arith.constant 0 : i32
    %c0_i32_0 = arith.constant 0 : i32
    %c0_i32_1 = arith.constant 0 : i32
    return %arg0, %c0_i32, %c0_i32_0 : i32, i32, i32
  }
  func.func @transform_1(%arg0: i32) -> (i32, i32, i32) {
    %c0_i32 = arith.constant 0 : i32
    %c0_i32_0 = arith.constant 0 : i32
    %c0_i32_1 = arith.constant 0 : i32
    return %arg0, %c0_i32, %c0_i32_0 : i32, i32, i32
  }
  func.func @transform_2(%arg0: i32) -> (i32, i32, i32) {
    %c0_i32 = arith.constant 0 : i32
    %c0_i32_0 = arith.constant 0 : i32
    %c0_i32_1 = arith.constant 0 : i32
    return %arg0, %c0_i32, %c0_i32_0 : i32, i32, i32
  }
}

module attributes {stable_mosaic.version = 11 : i64} {
  func.func @_box_head_kernel(%arg0: i32, %arg1: memref<16x512xbf16, #tpu.memory_space<vmem>>, %arg2: memref<512x128xbf16, #tpu.memory_space<vmem>>, %arg3: memref<1x128xf32, #tpu.memory_space<vmem>>, %arg4: memref<128x128xbf16, #tpu.memory_space<vmem>>, %arg5: memref<1x128xf32, #tpu.memory_space<vmem>>, %arg6: memref<128x25xbf16, #tpu.memory_space<vmem>>, %arg7: memref<1x25xf32, #tpu.memory_space<vmem>>, %arg8: memref<16x25xf32, #tpu.memory_space<vmem>>) attributes {dimension_semantics = [#tpu.dimension_semantics<arbitrary>], iteration_bounds = array<i64: 1>, scalar_prefetch = 0 : i64, scratch_operands = 0 : i64, tpu.core_type = #tpu.core_type<tc>, window_params = [{pipeline_mode = #tpu.pipeline_mode<synchronous>, transform_indices = @transform_0, window_bounds = array<i64: 16, 512>}, {pipeline_mode = #tpu.pipeline_mode<synchronous>, transform_indices = @transform_1, window_bounds = array<i64: 512, 128>}, {pipeline_mode = #tpu.pipeline_mode<synchronous>, transform_indices = @transform_2, window_bounds = array<i64: 1, 128>}, {pipeline_mode = #tpu.pipeline_mode<synchronous>, transform_indices = @transform_3, window_bounds = array<i64: 128, 128>}, {pipeline_mode = #tpu.pipeline_mode<synchronous>, transform_indices = @transform_4, window_bounds = array<i64: 1, 128>}, {pipeline_mode = #tpu.pipeline_mode<synchronous>, transform_indices = @transform_5, window_bounds = array<i64: 128, 25>}, {pipeline_mode = #tpu.pipeline_mode<synchronous>, transform_indices = @transform_6, window_bounds = array<i64: 1, 25>}, {pipeline_mode = #tpu.pipeline_mode<synchronous>, transform_indices = @transform_7, window_bounds = array<i64: 16, 25>}]} {
    %c0 = arith.constant 0 : index
    %c0_0 = arith.constant 0 : index
    %0 = vector.load %arg1[%c0, %c0_0] : memref<16x512xbf16, #tpu.memory_space<vmem>>, vector<16x512xbf16>
    %c0_1 = arith.constant 0 : index
    %c0_2 = arith.constant 0 : index
    %1 = vector.load %arg2[%c0_1, %c0_2] : memref<512x128xbf16, #tpu.memory_space<vmem>>, vector<512x128xbf16>
    %cst = arith.constant dense<0.000000e+00> : vector<16x128xf32>
    %2 = tpu.matmul %0, %1, %cst {dimension_numbers = #tpu.dot_dimension_numbers<[1], [0], [0], [1], [0, 0, 1, 1], [], []>} : vector<16x512xbf16>, vector<512x128xbf16>, vector<16x128xf32> -> vector<16x128xf32>
    %c0_3 = arith.constant 0 : index
    %c0_4 = arith.constant 0 : index
    %3 = vector.load %arg3[%c0_3, %c0_4] : memref<1x128xf32, #tpu.memory_space<vmem>>, vector<1x128xf32>
    %4 = vector.broadcast %3 : vector<1x128xf32> to vector<16x128xf32>
    %5 = arith.addf %2, %4 : vector<16x128xf32>
    %cst_5 = arith.constant 0.000000e+00 : f32
    %6 = vector.broadcast %cst_5 : f32 to vector<16x128xf32>
    %7 = arith.maximumf %5, %6 : vector<16x128xf32>
    %8 = arith.truncf %7 : vector<16x128xf32> to vector<16x128xbf16>
    %c0_6 = arith.constant 0 : index
    %c0_7 = arith.constant 0 : index
    %9 = vector.load %arg4[%c0_6, %c0_7] : memref<128x128xbf16, #tpu.memory_space<vmem>>, vector<128x128xbf16>
    %cst_8 = arith.constant dense<0.000000e+00> : vector<16x128xf32>
    %10 = tpu.matmul %8, %9, %cst_8 {dimension_numbers = #tpu.dot_dimension_numbers<[1], [0], [0], [1], [0, 0, 1, 1], [], []>} : vector<16x128xbf16>, vector<128x128xbf16>, vector<16x128xf32> -> vector<16x128xf32>
    %c0_9 = arith.constant 0 : index
    %c0_10 = arith.constant 0 : index
    %11 = vector.load %arg5[%c0_9, %c0_10] : memref<1x128xf32, #tpu.memory_space<vmem>>, vector<1x128xf32>
    %12 = vector.broadcast %11 : vector<1x128xf32> to vector<16x128xf32>
    %13 = arith.addf %10, %12 : vector<16x128xf32>
    %cst_11 = arith.constant 0.000000e+00 : f32
    %14 = vector.broadcast %cst_11 : f32 to vector<16x128xf32>
    %15 = arith.maximumf %13, %14 : vector<16x128xf32>
    %16 = arith.truncf %15 : vector<16x128xf32> to vector<16x128xbf16>
    %c0_12 = arith.constant 0 : index
    %c0_13 = arith.constant 0 : index
    %17 = vector.load %arg6[%c0_12, %c0_13] : memref<128x25xbf16, #tpu.memory_space<vmem>>, vector<128x25xbf16>
    %cst_14 = arith.constant dense<0.000000e+00> : vector<16x25xf32>
    %18 = tpu.matmul %16, %17, %cst_14 {dimension_numbers = #tpu.dot_dimension_numbers<[1], [0], [0], [1], [0, 0, 1, 1], [], []>} : vector<16x128xbf16>, vector<128x25xbf16>, vector<16x25xf32> -> vector<16x25xf32>
    %c0_15 = arith.constant 0 : index
    %c0_16 = arith.constant 0 : index
    %19 = vector.load %arg7[%c0_15, %c0_16] : memref<1x25xf32, #tpu.memory_space<vmem>>, vector<1x25xf32>
    %20 = vector.broadcast %19 : vector<1x25xf32> to vector<16x25xf32>
    %21 = arith.addf %18, %20 : vector<16x25xf32>
    %c0_17 = arith.constant 0 : index
    %c0_18 = arith.constant 0 : index
    %22 = vector.load %arg8[%c0_17, %c0_18] : memref<16x25xf32, #tpu.memory_space<vmem>>, vector<16x25xf32>
    tpu.vector_store %arg8[%c0_17, %c0_18], %21 {strides = array<i32>} : memref<16x25xf32, #tpu.memory_space<vmem>>, vector<16x25xf32>,
    return
  }
  func.func @transform_0(%arg0: i32) -> (i32, i32) {
    %c0_i32 = arith.constant 0 : i32
    %c0_i32_0 = arith.constant 0 : i32
    %c0_i32_1 = arith.constant 0 : i32
    return %c0_i32, %c0_i32_0 : i32, i32
  }
  func.func @transform_1(%arg0: i32) -> (i32, i32) {
    %c0_i32 = arith.constant 0 : i32
    %c0_i32_0 = arith.constant 0 : i32
    %c0_i32_1 = arith.constant 0 : i32
    return %c0_i32, %c0_i32_0 : i32, i32
  }
  func.func @transform_2(%arg0: i32) -> (i32, i32) {
    %c0_i32 = arith.constant 0 : i32
    %c0_i32_0 = arith.constant 0 : i32
    %c0_i32_1 = arith.constant 0 : i32
    return %c0_i32, %c0_i32_0 : i32, i32
  }
  func.func @transform_3(%arg0: i32) -> (i32, i32) {
    %c0_i32 = arith.constant 0 : i32
    %c0_i32_0 = arith.constant 0 : i32
    %c0_i32_1 = arith.constant 0 : i32
    return %c0_i32, %c0_i32_0 : i32, i32
  }
  func.func @transform_4(%arg0: i32) -> (i32, i32) {
    %c0_i32 = arith.constant 0 : i32
    %c0_i32_0 = arith.constant 0 : i32
    %c0_i32_1 = arith.constant 0 : i32
    return %c0_i32, %c0_i32_0 : i32, i32
  }
  func.func @transform_5(%arg0: i32) -> (i32, i32) {
    %c0_i32 = arith.constant 0 : i32
    %c0_i32_0 = arith.constant 0 : i32
    %c0_i32_1 = arith.constant 0 : i32
    return %c0_i32, %c0_i32_0 : i32, i32
  }
  func.func @transform_6(%arg0: i32) -> (i32, i32) {
    %c0_i32 = arith.constant 0 : i32
    %c0_i32_0 = arith.constant 0 : i32
    %c0_i32_1 = arith.constant 0 : i32
    return %c0_i32, %c0_i32_0 : i32, i32
  }
  func.func @transform_7(%arg0: i32) -> (i32, i32) {
    %c0_i32 = arith.constant 0 : i32
    %c0_i32_0 = arith.constant 0 : i32
    %c0_i32_1 = arith.constant 0 : i32
    return %c0_i32, %c0_i32_0 : i32, i32
  }
}

</mosaic_0001>

<bundles_post_ra>
// kernel: faster_rcnn_forward.6
= control target key start
LH: loop header
LB: loop body
LE: loop exit
PB: predicated region body
PF: predicated region fallthrough
CT: control target
= control target key end

     0   :  { %s1915_s12 = smov 0   ;;  %s2224_s0 = inlined_call_operand.vmem [shape: bf16[2,544,9], index: 0, kind: input, shape index: {}]   ;;  %s2225_s1 = inlined_call_operand.vmem [shape: bf16[3,9,16], index: 1, kind: input, shape index: {}]   ;;  %s2226_s2 = inlined_call_operand.vmem [shape: f32[1,16], index: 2, kind: input, shape index: {}]   ;;  %s2227_s3 = inlined_call_operand.vmem [shape: bf16[2,256,16], index: 3, kind: output, shape index: {}]  }
   0x1 LB: > { %s1491_s13 = sadd.s32 4294967295, %s1892_s12   ;;  %p1495_p0 = scmp.ge.s32.totalorder %s1892_s12, 1  ;;  %s1892_s12 = sphi %s1915_s12, %s13_s12  }
   0x2   : > { %p137_p1 = scmp.lt.s32.totalorder %s1892_s12, 3 }
   0x4   : > { %p138_p2 = pnand %p1495_p0, %p137_p1 }
   0x5   : > { %p161_p3 = scmp.lt.s32.totalorder (!%p138_p2), %s1491_s13, 1 }
   0x6   : > { %141 = sbr.rel (%p138_p2) target bundleno = 318 (0x13e), region = 32 }
   0xb   : > { %v1835_v0 = vld [vmem:[%s2225_s1 + $0x8] sm:$0x1f]   ;;  %vm375_vm0 = vcmask 1043456   ;;  %vm376_vm1 = vcmask 1044480   ;;  %v1894_v1 = vmov 65535   ;;  %s2229_s13 = smov (!%p161_p3, %s1491_s13), 1 }
   0xc   : > { %v377_v2 = vsel %vm375_vm0, 4294967295, %v1894_v1  ;;  %v1838_v4 = vld [vmem:[%s2225_s1] sm:$0x1f]   ;;  %v1841_v6 = vld [vmem:[%s2225_s1 + $0x10] sm:$0x1f]   ;;  %s1825_s20 = smul.u32 272, %s2229_s13 }
   0xd   : > { %v378_v3 = vsel %vm376_vm1, %v377_v2, 0  ;;  %vm326_vm2 = vcmask 72704   ;;  %s1637_s26 = sshll.u32 %s2229_s13, 7  ;;  %vm1403_vm3 = vcmask 125952  }
   0xe   : > { %v380_v5 = vand.u32 %v1835_v0, %v378_v3  ;;  %v677_v7 = vand.u32 %v1838_v4, %v378_v3  ;;  %v1009_v8 = vand.u32 %v1841_v6, %v378_v3  ;;  %s1938_s23 = scalar_lea.vmem %s2224_s0, %s1825_s20  ;;  %s2099_s29 = scalar_lea.vmem %s2227_s3, %s1637_s26 }
   0xf   : > { %v1836_v9 = vld [vmem:[%s1938_s23 + $0x88] sm:$0xff]   ;;  %v1839_v11 = vld [vmem:[%s1938_s23 + $0x90] sm:$0xff]   ;;  %v1842_v13 = vld [vmem:[%s1938_s23 + $0x98] sm:$0xff]  }
  0x10   : > { %1823 = vmatprep.subr.bf16.mxu1 %v380_v5  ;;  %1721 = vmatprep.subr.bf16.mxu0 %v380_v5  ;;  %v1837_v10 = vld [vmem:[%s1938_s23 + $0xc8] sm:$0xff]   ;;  %v1840_v12 = vld [vmem:[%s1938_s23 + $0xd0] sm:$0xff]   ;;  %v1843_v14 = vld [vmem:[%s1938_s23 + $0xd8] sm:$0xff]  }
  0x11   : > { %1824 = vmatpush3.bf16.msra.mxu1 %v380_v5  ;;  %1722 = vmatpush3.bf16.msra.mxu0 %v380_v5  ;;  %v1844_v15 = vld [vmem:[%s1938_s23 + $0xa0] sm:$0xff]   ;;  %v1846_v17 = vld [vmem:[%s1938_s23 + $0xa8] sm:$0xff]   ;;  %v1848_v19 = vld [vmem:[%s1938_s23 + $0xb0] sm:$0xff]  }
  0x12   : > { %1755 = vmatprep.subr.bf16.mxu1 %v677_v7  ;;  %1789 = vmatprep.subr.bf16.mxu0 %v1009_v8  ;;  %v1845_v16 = vld [vmem:[%s1938_s23 + $0xe0] sm:$0xff]   ;;  %v1847_v18 = vld [vmem:[%s1938_s23 + $0xe8] sm:$0xff]   ;;  %v1849_v20 = vld [vmem:[%s1938_s23 + $0xf0] sm:$0xff]  }
  0x13   : > { %1723 = vmatprep.mubr.msk.bf16.mxu0 %vm326_vm2, %v1836_v9  ;;  %1739 = vmatprep.mubr.msk.bf16.mxu1 %vm326_vm2, %v1837_v10  ;;  %v1850_v21 = vld [vmem:[%s1938_s23 + $0xb8] sm:$0xff]   ;;  %v1852_v23 = vld [vmem:[%s1938_s23 + $0xc0] sm:$0xff]   ;;  %v1855_v25 = vld [vmem:[%s1938_s23 + $0x8] sm:$0xff]  }
  0x14   : > { %1724 = vmatmul.mubr.msk.bf16.vlgmr.msra.gmra.mxu0 %vm326_vm2, %v1839_v11  ;;  %1740 = vmatmul.mubr.msk.bf16.vlgmr.msra.gmra.mxu1 %vm326_vm2, %v1840_v12  ;;  %v1851_v22 = vld [vmem:[%s1938_s23 + $0xf8] sm:$0xff]   ;;  %v1853_v24 = vld [vmem:[%s1938_s23 + $0x100] sm:$0xff]   ;;  %v1856_v27 = vld [vmem:[%s1938_s23 + $0x8] sm:$0xff]  }
  0x15   : > { %1790 = vmatpush3.bf16.msra.mxu0 %v1009_v8  ;;  %1756 = vmatpush3.bf16.msra.mxu1 %v677_v7  ;;  %v1854_v26 = vld [vmem:[%s1938_s23] sm:$0xff]   ;;  %v1857_v28 = vld [vmem:[%s1938_s23 + $0x10] sm:$0xff]   ;;  %v1859_v29 = vld [vmem:[%s1938_s23 + $0x18] sm:$0xff]  }
  0x16   : > { %1727 = vmatprep.mubr.msk.bf16.mxu0 %vm326_vm2, %v1842_v13  ;;  %1743 = vmatprep.mubr.msk.bf16.mxu1 %vm326_vm2, %v1843_v14  ;;  %v1858_v30 = vld [vmem:[%s1938_s23 + $0x10] sm:$0xff]   ;;  %v1860_v31 = vld [vmem:[%s1938_s23 + $0x18] sm:$0xff]   ;;  %v1861_v32 = vld [vmem:[%s1938_s23 + $0x20] sm:$0xff]  }
  0x17   : > { %v1863_v33 = vld [vmem:[%s1938_s23 + $0x28] sm:$0xff]   ;;  %v1862_v34 = vld [vmem:[%s1938_s23 + $0x20] sm:$0xff]   ;;  %v1865_v35 = vld [vmem:[%s1938_s23 + $0x30] sm:$0xff]  }
  0x18   : > { %v1864_v36 = vld [vmem:[%s1938_s23 + $0x28] sm:$0xff]   ;;  %v1867_v37 = vld [vmem:[%s1938_s23 + $0x38] sm:$0xff]   ;;  %v1866_v38 = vld [vmem:[%s1938_s23 + $0x30] sm:$0xff]  }
  0x19   : > { %v1869_v39 = vld [vmem:[%s1938_s23 + $0x40] sm:$0xff]   ;;  %v1868_v40 = vld [vmem:[%s1938_s23 + $0x38] sm:$0xff]   ;;  %v1871_v41 = vld [vmem:[%s1938_s23 + $0x48] sm:$0xff]  }
  0x1a   : > { %v1870_v42 = vld [vmem:[%s1938_s23 + $0x40] sm:$0xff]   ;;  %v1873_v43 = vld [vmem:[%s1938_s23 + $0x50] sm:$0xff]   ;;  %v1872_v44 = vld [vmem:[%s1938_s23 + $0x48] sm:$0xff]  }
  0x1b   : > { %v1875_v45 = vld [vmem:[%s1938_s23 + $0x58] sm:$0xff]   ;;  %v1874_v46 = vld [vmem:[%s1938_s23 + $0x50] sm:$0xff]   ;;  %v1877_v47 = vld [vmem:[%s1938_s23 + $0x60] sm:$0xff]  }
  0x1c   : > { %1728 = vmatmul.mubr.msk.bf16.gmra.mxu0 %vm326_vm2, %v1844_v15  ;;  %1744 = vmatmul.mubr.msk.bf16.gmra.mxu1 %vm326_vm2, %v1845_v16  ;;  %v1876_v48 = vld [vmem:[%s1938_s23 + $0x58] sm:$0xff]   ;;  %v1879_v49 = vld [vmem:[%s1938_s23 + $0x68] sm:$0xff]   ;;  %v1878_v50 = vld [vmem:[%s1938_s23 + $0x60] sm:$0xff]  }
  0x1d   : > { %1731 = vmatprep.mubr.msk.bf16.mxu0 %vm326_vm2, %v1846_v17  ;;  %1747 = vmatprep.mubr.msk.bf16.mxu1 %vm326_vm2, %v1847_v18  ;;  %v1881_v51 = vld [vmem:[%s1938_s23 + $0x70] sm:$0xff]   ;;  %v1880_v52 = vld [vmem:[%s1938_s23 + $0x68] sm:$0xff]   ;;  %v1883_v53 = vld [vmem:[%s1938_s23 + $0x78] sm:$0xff]  }
  0x1e   : > { %v1882_v54 = vld [vmem:[%s1938_s23 + $0x70] sm:$0xff]   ;;  %v1885_v55 = vld [vmem:[%s1938_s23 + $0x80] sm:$0xff]   ;;  %v1884_v56 = vld [vmem:[%s1938_s23 + $0x78] sm:$0xff]  }
  0x24   : > { %1732 = vmatmul.mubr.msk.bf16.gmra.mxu0 %vm326_vm2, %v1848_v19  ;;  %1748 = vmatmul.mubr.msk.bf16.gmra.mxu1 %vm326_vm2, %v1849_v20 }
  0x25   : > { %1735 = vmatprep.mubr.msk.bf16.mxu0 %vm326_vm2, %v1850_v21  ;;  %1751 = vmatprep.mubr.msk.bf16.mxu1 %vm326_vm2, %v1851_v22 }
  0x2c   : > { %1736 = vmatmul.mubr.msk.bf16.gmra.mxu0 %vm326_vm2, %v1852_v23  ;;  %1752 = vmatmul.mubr.msk.bf16.gmra.mxu1 %vm326_vm2, %v1853_v24 }
  0x2d   : > { %1791 = vmatprep.mubr.msk.bf16.mxu0 %vm326_vm2, %v1855_v25  ;;  %1757 = vmatprep.mubr.msk.bf16.mxu1 %vm326_vm2, %v1854_v26 }
  0x34   : > { %1792 = vmatmul.mubr.msk.bf16.vlgmr.msra.gmra.mxu0 %vm326_vm2, %v1857_v28  ;;  %1758 = vmatmul.mubr.msk.bf16.vlgmr.msra.gmra.mxu1 %vm326_vm2, %v1856_v27 }
  0x35   : > { %1795 = vmatprep.mubr.msk.bf16.mxu0 %vm326_vm2, %v1859_v29  ;;  %1761 = vmatprep.mubr.msk.bf16.mxu1 %vm326_vm2, %v1858_v30  ;;  %v2091_v29 = vld [vmem:[%s2226_s2] ss:$0 sm:$0xff] }
  0x3c   : > { %1796 = vmatmul.mubr.msk.bf16.gmra.mxu0 %vm326_vm2, %v1861_v32  ;;  %1762 = vmatmul.mubr.msk.bf16.gmra.mxu1 %vm326_vm2, %v1860_v31 }
  0x3d   : > { %1799 = vmatprep.mubr.msk.bf16.mxu0 %vm326_vm2, %v1863_v33  ;;  %1765 = vmatprep.mubr.msk.bf16.mxu1 %vm326_vm2, %v1862_v34 }
  0x44   : > { %1800 = vmatmul.mubr.msk.bf16.gmra.mxu0 %vm326_vm2, %v1865_v35  ;;  %1766 = vmatmul.mubr.msk.bf16.gmra.mxu1 %vm326_vm2, %v1864_v36 }
  0x45   : > { %1803 = vmatprep.mubr.msk.bf16.mxu0 %vm326_vm2, %v1867_v37  ;;  %1769 = vmatprep.mubr.msk.bf16.mxu1 %vm326_vm2, %v1866_v38 }
  0x4c   : > { %1804 = vmatmul.mubr.msk.bf16.gmra.mxu0 %vm326_vm2, %v1869_v39  ;;  %1770 = vmatmul.mubr.msk.bf16.gmra.mxu1 %vm326_vm2, %v1868_v40 }
  0x4d   : > { %1807 = vmatprep.mubr.msk.bf16.mxu0 %vm326_vm2, %v1871_v41  ;;  %1773 = vmatprep.mubr.msk.bf16.mxu1 %vm326_vm2, %v1870_v42 }
  0x54   : > { %1808 = vmatmul.mubr.msk.bf16.gmra.mxu0 %vm326_vm2, %v1873_v43  ;;  %1774 = vmatmul.mubr.msk.bf16.gmra.mxu1 %vm326_vm2, %v1872_v44 }
  0x55   : > { %1811 = vmatprep.mubr.msk.bf16.mxu0 %vm326_vm2, %v1875_v45  ;;  %1777 = vmatprep.mubr.msk.bf16.mxu1 %vm326_vm2, %v1874_v46 }
  0x5c   : > { %1812 = vmatmul.mubr.msk.bf16.gmra.mxu0 %vm326_vm2, %v1877_v47  ;;  %1778 = vmatmul.mubr.msk.bf16.gmra.mxu1 %vm326_vm2, %v1876_v48 }
  0x5d   : > { %1815 = vmatprep.mubr.msk.bf16.mxu0 %vm326_vm2, %v1879_v49  ;;  %1781 = vmatprep.mubr.msk.bf16.mxu1 %vm326_vm2, %v1878_v50 }
  0x64   : > { %1816 = vmatmul.mubr.msk.bf16.gmra.mxu0 %vm326_vm2, %v1881_v51  ;;  %1782 = vmatmul.mubr.msk.bf16.gmra.mxu1 %vm326_vm2, %v1880_v52 }
  0x65   : > { %1819 = vmatprep.mubr.msk.bf16.mxu0 %vm326_vm2, %v1883_v53  ;;  %1785 = vmatprep.mubr.msk.bf16.mxu1 %vm326_vm2, %v1882_v54 }
  0x6c   : > { %1820 = vmatmul.mubr.msk.bf16.gmra.mxu0 %vm326_vm2, %v1885_v55  ;;  %1786 = vmatmul.mubr.msk.bf16.gmra.mxu1 %vm326_vm2, %v1884_v56 }
  0xd4   : > { %v1725_v57 = vpop.f32.mrf.mxu0  ;;  %v2036_v58 = vpop.f32.mrf.mxu1 }
  0xd6   : > { %v416_v59 = vpop.f32.mrf.mxu0  ;;  %v2038_v60 = vpop.f32.mrf.mxu1 }
  0xd8   : > { %v1726_v61 = vpop.f32.mrf.mxu0  ;;  %v2040_v62 = vpop.f32.mrf.mxu1 }
  0xda   : > { %v419_v63 = vpop.f32.mrf.mxu0  ;;  %v2042_v0 = vpop.f32.mrf.mxu1 }
  0xdc   : > { %v1729_v1 = vpop.f32.mrf.mxu0  ;;  %v2044_v2 = vpop.f32.mrf.mxu1 }
  0xde   : > { %v432_v3 = vpop.f32.mrf.mxu0  ;;  %v2046_v4 = vpop.f32.mrf.mxu1 }
  0xe0   : > { %v2048_v5 = vpop.f32.mrf.mxu0  ;;  %v2050_v6 = vpop.f32.mrf.mxu1 }
  0xe2   : > { %v2052_v7 = vpop.f32.mrf.mxu0  ;;  %v2054_v8 = vpop.f32.mrf.mxu1 }
  0xe4   : > { %v2056_v9 = vpop.f32.mrf.mxu0  ;;  %v2058_v10 = vpop.f32.mrf.mxu1 }
  0xe6   : > { %v2060_v11 = vpop.f32.mrf.mxu0  ;;  %v2062_v12 = vpop.f32.mrf.mxu1 }
  0xe8   : > { %v2064_v13 = vpop.f32.mrf.mxu0  ;;  %v2066_v14 = vpop.f32.mrf.mxu1 }
  0xea   : > { %v2068_v15 = vpop.f32.mrf.mxu0  ;;  %v2070_v16 = vpop.f32.mrf.mxu1 }
  0xec   : > { %v2072_v17 = vpop.f32.mrf.mxu0  ;;  %v2074_v18 = vpop.f32.mrf.mxu1 }
  0xee   : > { %v2076_v19 = vpop.f32.mrf.mxu0  ;;  %v2078_v20 = vpop.f32.mrf.mxu1 }
  0xf0   : > { %v2080_v21 = vpop.f32.mrf.mxu0  ;;  %v2082_v22 = vpop.f32.mrf.mxu1 }
  0xf2   : > { %v2084_v23 = vpop.f32.mrf.mxu0  ;;  %v2086_v24 = vpop.f32.mrf.mxu1 }
  0xf4   : > { %v1793_v25 = vpop.f32.mrf.mxu0  ;;  %v1759_v26 = vpop.f32.mrf.mxu1 }
  0xf5   : > { %v722_v27 = vadd.f32 %v1759_v26, %v1725_v57 }
  0xf6   : > { %v1045_v28 = vpop.f32.mrf.mxu0  ;;  %v713_v30 = vpop.f32.mrf.mxu1 }
  0xf7   : > { %v1174_v31 = vadd.f32 %v1793_v25, %v722_v27  ;;  %v714_v32 = vadd.f32 %v713_v30, %v416_v59 }
  0xf8   : > { %v1794_v33 = vpop.f32.mrf.mxu0  ;;  %v1760_v34 = vpop.f32.mrf.mxu1 }
  0xf9   : > { %v1213_v35 = vadd.f32 %v2091_v29, %v1174_v31  ;;  %v1172_v36 = vadd.f32 %v1045_v28, %v714_v32  ;;  %v725_v37 = vadd.f32 %v1760_v34, %v1726_v61 }
  0xfa   : > { %v1048_v38 = vpop.f32.mrf.mxu0  ;;  %v716_v39 = vpop.f32.mrf.mxu1 }
  0xfb   : > { %v1245_v40 = vmax.f32 %v1213_v35, 0.0  ;;  %v1211_v41 = vadd.f32 %v2091_v29, %v1172_v36  ;;  %v1175_v42 = vadd.f32 %v1794_v33, %v725_v37  ;;  %v717_v43 = vadd.f32 %v716_v39, %v419_v63 }
  0xfc   : > { %v1797_v44 = vpop.f32.mrf.mxu0  ;;  %v1763_v45 = vpop.f32.mrf.mxu1 }
  0xfd   : > { %v1640_v46 = vpack.c.bf16 %v1245_v40, %v1245_v40  ;;  %v1243_v47 = vmax.f32 %v1211_v41, 0.0  ;;  %v1214_v48 = vadd.f32 %v2091_v29, %v1175_v42  ;;  %v1173_v49 = vadd.f32 %v1048_v38, %v717_v43 }
  0xfe   : > { %v1061_v50 = vpop.f32.mrf.mxu0  ;;  %v738_v51 = vadd.f32 %v1763_v45, %v1729_v1  ;;  %v729_v52 = vpop.f32.mrf.mxu1 }
  0xff   : > { %1406 = vst.msk [vmem:[%s2099_s29 + $0x8] sm:$0xf] %vm1403_vm3, %v1640_v46  ;;  %v1638_v53 = vpack.c.bf16 %v1243_v47, %v1243_v47  ;;  %v1246_v54 = vmax.f32 %v1214_v48, 0.0  ;;  %v1212_v55 = vadd.f32 %v2091_v29, %v1173_v49  ;;  %v730_v56 = vadd.f32 %v729_v52, %v432_v3 }
 0x100   : > { %v1798_v57 = vpop.f32.mrf.mxu0  ;;  %v1178_v59 = vadd.f32 %v1797_v44, %v738_v51  ;;  %v1764_v61 = vpop.f32.mrf.mxu1 }
 0x101   : > { %1404 = vst.msk [vmem:[%s2099_s29] sm:$0xf] %vm1403_vm3, %v1638_v53  ;;  %v1641_v63 = vpack.c.bf16 %v1246_v54, %v1246_v54  ;;  %v1244_v25 = vmax.f32 %v1212_v55, 0.0  ;;  %v1176_v26 = vadd.f32 %v1061_v50, %v730_v56  ;;  %v741_v1 = vadd.f32 %v1764_v61, %v2048_v5 }
 0x102   : > { %v1064_v27 = vpop.f32.mrf.mxu0  ;;  %v1217_v28 = vadd.f32 %v2091_v29, %v1178_v59  ;;  %v732_v30 = vpop.f32.mrf.mxu1 }
 0x103   : > { %1407 = vst.msk [vmem:[%s2099_s29 + $0xc] sm:$0xf] %vm1403_vm3, %v1641_v63  ;;  %v1639_v31 = vpack.c.bf16 %v1244_v25, %v1244_v25  ;;  %v1215_v3 = vadd.f32 %v2091_v29, %v1176_v26  ;;  %v1179_v32 = vadd.f32 %v1798_v57, %v741_v1  ;;  %v733_v33 = vadd.f32 %v732_v30, %v2052_v7 }
 0x104   : > { %v1801_v34 = vpop.f32.mrf.mxu0  ;;  %v1249_v35 = vmax.f32 %v1217_v28, 0.0  ;;  %v1767_v36 = vpop.f32.mrf.mxu1 }
 0x105   : > { %1405 = vst.msk [vmem:[%s2099_s29 + $0x4] sm:$0xf] %vm1403_vm3, %v1639_v31  ;;  %v1247_v5 = vmax.f32 %v1215_v3, 0.0  ;;  %v1218_v37 = vadd.f32 %v2091_v29, %v1179_v32  ;;  %v1177_v38 = vadd.f32 %v1064_v27, %v733_v33  ;;  %v754_v39 = vadd.f32 %v1767_v36, %v2056_v9 }
 0x106   : > { %v1077_v40 = vpop.f32.mrf.mxu0  ;;  %v1644_v41 = vpack.c.bf16 %v1249_v35, %v1249_v35  ;;  %v745_v42 = vpop.f32.mrf.mxu1 }
 0x107   : > { %v1642_v43 = vpack.c.bf16 %v1247_v5, %v1247_v5  ;;  %v1250_v44 = vmax.f32 %v1218_v37, 0.0  ;;  %v1216_v7 = vadd.f32 %v2091_v29, %v1177_v38  ;;  %v1182_v45 = vadd.f32 %v1801_v34, %v754_v39 }
 0x108   : > { %v1802_v46 = vpop.f32.mrf.mxu0  ;;  %1410 = vst.msk [vmem:[%s2099_s29 + $0x18] sm:$0xf] %vm1403_vm3, %v1644_v41  ;;  %v746_v47 = vadd.f32 %v745_v42, %v2060_v11  ;;  %v1768_v48 = vpop.f32.mrf.mxu1 }
 0x109   : > { %1408 = vst.msk [vmem:[%s2099_s29 + $0x10] sm:$0xf] %vm1403_vm3, %v1642_v43  ;;  %v1645_v49 = vpack.c.bf16 %v1250_v44, %v1250_v44  ;;  %v1248_v9 = vmax.f32 %v1216_v7, 0.0  ;;  %v1221_v50 = vadd.f32 %v2091_v29, %v1182_v45  ;;  %v757_v51 = vadd.f32 %v1768_v48, %v2064_v13 }
 0x10a   : > { %v1080_v52 = vpop.f32.mrf.mxu0  ;;  %v1180_v53 = vadd.f32 %v1077_v40, %v746_v47  ;;  %v748_v54 = vpop.f32.mrf.mxu1 }
 0x10b   : > { %1411 = vst.msk [vmem:[%s2099_s29 + $0x1c] sm:$0xf] %vm1403_vm3, %v1645_v49  ;;  %v1643_v55 = vpack.c.bf16 %v1248_v9, %v1248_v9  ;;  %v1253_v56 = vmax.f32 %v1221_v50, 0.0  ;;  %v1183_v57 = vadd.f32 %v1802_v46, %v757_v51  ;;  %v749_v11 = vadd.f32 %v748_v54, %v2068_v15 }
 0x10c   : > { %v1805_v59 = vpop.f32.mrf.mxu0  ;;  %v1219_v61 = vadd.f32 %v2091_v29, %v1180_v53  ;;  %v1771_v63 = vpop.f32.mrf.mxu1 }
 0x10d   : > { %1409 = vst.msk [vmem:[%s2099_s29 + $0x14] sm:$0xf] %vm1403_vm3, %v1643_v55  ;;  %v1648_v25 = vpack.c.bf16 %v1253_v56, %v1253_v56  ;;  %v1222_v13 = vadd.f32 %v2091_v29, %v1183_v57  ;;  %v1181_v26 = vadd.f32 %v1080_v52, %v749_v11  ;;  %v770_v1 = vadd.f32 %v1771_v63, %v2072_v17 }
 0x10e   : > { %v1093_v27 = vpop.f32.mrf.mxu0  ;;  %v1251_v28 = vmax.f32 %v1219_v61, 0.0  ;;  %v761_v30 = vpop.f32.mrf.mxu1 }
 0x10f   : > { %1414 = vst.msk [vmem:[%s2099_s29 + $0x28] sm:$0xf] %vm1403_vm3, %v1648_v25  ;;  %v1254_v15 = vmax.f32 %v1222_v13, 0.0  ;;  %v1220_v31 = vadd.f32 %v2091_v29, %v1181_v26  ;;  %v1186_v3 = vadd.f32 %v1805_v59, %v770_v1  ;;  %v762_v32 = vadd.f32 %v761_v30, %v2076_v19 }
 0x110   : > { %v1806_v33 = vpop.f32.mrf.mxu0  ;;  %v1646_v34 = vpack.c.bf16 %v1251_v28, %v1251_v28  ;;  %v1772_v35 = vpop.f32.mrf.mxu1 }
 0x111   : > { %v1649_v36 = vpack.c.bf16 %v1254_v15, %v1254_v15  ;;  %v1252_v5 = vmax.f32 %v1220_v31, 0.0  ;;  %v1225_v17 = vadd.f32 %v2091_v29, %v1186_v3  ;;  %v1184_v37 = vadd.f32 %v1093_v27, %v762_v32 }
 0x112   : > { %v1096_v38 = vpop.f32.mrf.mxu0  ;;  %1412 = vst.msk [vmem:[%s2099_s29 + $0x20] sm:$0xf] %vm1403_vm3, %v1646_v34  ;;  %v773_v39 = vadd.f32 %v1772_v35, %v2080_v21  ;;  %v764_v40 = vpop.f32.mrf.mxu1 }
 0x113   : > { %1415 = vst.msk [vmem:[%s2099_s29 + $0x2c] sm:$0xf] %vm1403_vm3, %v1649_v36  ;;  %v1647_v41 = vpack.c.bf16 %v1252_v5, %v1252_v5  ;;  %v1257_v19 = vmax.f32 %v1225_v17, 0.0  ;;  %v1223_v42 = vadd.f32 %v2091_v29, %v1184_v37  ;;  %v765_v43 = vadd.f32 %v764_v40, %v2084_v23 }
 0x114   : > { %v1809_v44 = vpop.f32.mrf.mxu0  ;;  %v1187_v7 = vadd.f32 %v1806_v33, %v773_v39  ;;  %v1775_v45 = vpop.f32.mrf.mxu1 }
 0x115   : > { %1413 = vst.msk [vmem:[%s2099_s29 + $0x24] sm:$0xf] %vm1403_vm3, %v1647_v41  ;;  %v1652_v46 = vpack.c.bf16 %v1257_v19, %v1257_v19  ;;  %v1255_v47 = vmax.f32 %v1223_v42, 0.0  ;;  %v1185_v48 = vadd.f32 %v1096_v38, %v765_v43  ;;  %v786_v21 = vadd.f32 %v1775_v45, %v2036_v58 }
 0x116   : > { %v1109_v49 = vpop.f32.mrf.mxu0  ;;  %v1226_v9 = vadd.f32 %v2091_v29, %v1187_v7  ;;  %v777_v50 = vpop.f32.mrf.mxu1 }
 0x117   : > { %1418 = vst.msk [vmem:[%s2099_s29 + $0x38] sm:$0xf] %vm1403_vm3, %v1652_v46  ;;  %v1650_v51 = vpack.c.bf16 %v1255_v47, %v1255_v47  ;;  %v1224_v23 = vadd.f32 %v2091_v29, %v1185_v48  ;;  %v1190_v52 = vadd.f32 %v1809_v44, %v786_v21  ;;  %v778_v53 = vadd.f32 %v777_v50, %v2038_v60 }
 0x118   : > { %v1810_v54 = vpop.f32.mrf.mxu0  ;;  %v1258_v55 = vmax.f32 %v1226_v9, 0.0  ;;  %v1776_v56 = vpop.f32.mrf.mxu1 }
 0x119   : > { %1416 = vst.msk [vmem:[%s2099_s29 + $0x30] sm:$0xf] %vm1403_vm3, %v1650_v51  ;;  %v1256_v58 = vmax.f32 %v1224_v23, 0.0  ;;  %v1229_v57 = vadd.f32 %v2091_v29, %v1190_v52  ;;  %v1188_v11 = vadd.f32 %v1109_v49, %v778_v53  ;;  %v789_v59 = vadd.f32 %v1776_v56, %v2040_v62 }
 0x11a   : > { %v1112_v61 = vpop.f32.mrf.mxu0  ;;  %v1653_v63 = vpack.c.bf16 %v1258_v55, %v1258_v55  ;;  %v780_v25 = vpop.f32.mrf.mxu1 }
 0x11b   : > { %v1651_v13 = vpack.c.bf16 %v1256_v58, %v1256_v58  ;;  %v1261_v26 = vmax.f32 %v1229_v57, 0.0  ;;  %v1227_v60 = vadd.f32 %v2091_v29, %v1188_v11  ;;  %v1191_v1 = vadd.f32 %v1810_v54, %v789_v59 }
 0x11c   : > { %v1813_v27 = vpop.f32.mrf.mxu0  ;;  %1419 = vst.msk [vmem:[%s2099_s29 + $0x3c] sm:$0xf] %vm1403_vm3, %v1653_v63  ;;  %v781_v28 = vadd.f32 %v780_v25, %v2042_v0  ;;  %v1779_v30 = vpop.f32.mrf.mxu1 }
 0x11d   : > { %1417 = vst.msk [vmem:[%s2099_s29 + $0x34] sm:$0xf] %vm1403_vm3, %v1651_v13  ;;  %v1656_v15 = vpack.c.bf16 %v1261_v26, %v1261_v26  ;;  %v1259_v62 = vmax.f32 %v1227_v60, 0.0  ;;  %v1230_v31 = vadd.f32 %v2091_v29, %v1191_v1  ;;  %v802_v3 = vadd.f32 %v1779_v30, %v2044_v2 }
 0x11e   : > { %v1125_v32 = vpop.f32.mrf.mxu0  ;;  %v1189_v33 = vadd.f32 %v1112_v61, %v781_v28  ;;  %v793_v34 = vpop.f32.mrf.mxu1 }
 0x11f   : > { %1422 = vst.msk [vmem:[%s2099_s29 + $0x48] sm:$0xf] %vm1403_vm3, %v1656_v15  ;;  %v1654_v35 = vpack.c.bf16 %v1259_v62, %v1259_v62  ;;  %v1262_v36 = vmax.f32 %v1230_v31, 0.0  ;;  %v1194_v5 = vadd.f32 %v1813_v27, %v802_v3  ;;  %v794_v0 = vadd.f32 %v793_v34, %v2046_v4 }
 0x120   : > { %v1814_v17 = vpop.f32.mrf.mxu0  ;;  %v1228_v37 = vadd.f32 %v2091_v29, %v1189_v33  ;;  %v1780_v38 = vpop.f32.mrf.mxu1 }
 0x121   : > { %1420 = vst.msk [vmem:[%s2099_s29 + $0x40] sm:$0xf] %vm1403_vm3, %v1654_v35  ;;  %v1657_v39 = vpack.c.bf16 %v1262_v36, %v1262_v36  ;;  %v1233_v2 = vadd.f32 %v2091_v29, %v1194_v5  ;;  %v1192_v40 = vadd.f32 %v1125_v32, %v794_v0  ;;  %v805_v41 = vadd.f32 %v1780_v38, %v2050_v6 }
 0x122   : > { %v1128_v19 = vpop.f32.mrf.mxu0  ;;  %v1260_v42 = vmax.f32 %v1228_v37, 0.0  ;;  %v796_v43 = vpop.f32.mrf.mxu1 }
 0x123   : > { %1423 = vst.msk [vmem:[%s2099_s29 + $0x4c] sm:$0xf] %vm1403_vm3, %v1657_v39  ;;  %v1265_v4 = vmax.f32 %v1233_v2, 0.0  ;;  %v1231_v44 = vadd.f32 %v2091_v29, %v1192_v40  ;;  %v1195_v7 = vadd.f32 %v1814_v17, %v805_v41  ;;  %v797_v45 = vadd.f32 %v796_v43, %v2054_v8 }
 0x124   : > { %v1817_v46 = vpop.f32.mrf.mxu0  ;;  %v1655_v47 = vpack.c.bf16 %v1260_v42, %v1260_v42  ;;  %v1783_v48 = vpop.f32.mrf.mxu1 }
 0x125   : > { %v1660_v21 = vpack.c.bf16 %v1265_v4, %v1265_v4  ;;  %v1263_v49 = vmax.f32 %v1231_v44, 0.0  ;;  %v1234_v6 = vadd.f32 %v2091_v29, %v1195_v7  ;;  %v1193_v9 = vadd.f32 %v1128_v19, %v797_v45 }
 0x126   : > { %v1141_v50 = vpop.f32.mrf.mxu0  ;;  %1421 = vst.msk [vmem:[%s2099_s29 + $0x44] sm:$0xf] %vm1403_vm3, %v1655_v47  ;;  %v818_v51 = vadd.f32 %v1783_v48, %v2058_v10  ;;  %v809_v23 = vpop.f32.mrf.mxu1 }
 0x127   : > { %1426 = vst.msk [vmem:[%s2099_s29 + $0x58] sm:$0xf] %vm1403_vm3, %v1660_v21  ;;  %v1658_v52 = vpack.c.bf16 %v1263_v49, %v1263_v49  ;;  %v1266_v8 = vmax.f32 %v1234_v6, 0.0  ;;  %v1232_v53 = vadd.f32 %v2091_v29, %v1193_v9  ;;  %v810_v54 = vadd.f32 %v809_v23, %v2062_v12 }
 0x128   : > { %v1818_v55 = vpop.f32.mrf.mxu0  ;;  %v1198_v56 = vadd.f32 %v1817_v46, %v818_v51  ;;  %v1784_v58 = vpop.f32.mrf.mxu1 }
 0x129   : > { %1424 = vst.msk [vmem:[%s2099_s29 + $0x50] sm:$0xf] %vm1403_vm3, %v1658_v52  ;;  %v1661_v57 = vpack.c.bf16 %v1266_v8, %v1266_v8  ;;  %v1264_v11 = vmax.f32 %v1232_v53, 0.0  ;;  %v1196_v59 = vadd.f32 %v1141_v50, %v810_v54  ;;  %v821_v10 = vadd.f32 %v1784_v58, %v2066_v14 }
 0x12a   : > { %v1144_v61 = vpop.f32.mrf.mxu0  ;;  %v1237_v63 = vadd.f32 %v2091_v29, %v1198_v56  ;;  %v812_v25 = vpop.f32.mrf.mxu1 }
 0x12b   : > { %1427 = vst.msk [vmem:[%s2099_s29 + $0x5c] sm:$0xf] %vm1403_vm3, %v1661_v57  ;;  %v1659_v13 = vpack.c.bf16 %v1264_v11, %v1264_v11  ;;  %v1235_v12 = vadd.f32 %v2091_v29, %v1196_v59  ;;  %v1199_v26 = vadd.f32 %v1818_v55, %v821_v10  ;;  %v813_v60 = vadd.f32 %v812_v25, %v2070_v16 }
 0x12c   : > { %v1821_v1 = vpop.f32.mrf.mxu0  ;;  %v1269_v27 = vmax.f32 %v1237_v63, 0.0  ;;  %v1787_v28 = vpop.f32.mrf.mxu1 }
 0x12d   : > { %1425 = vst.msk [vmem:[%s2099_s29 + $0x54] sm:$0xf] %vm1403_vm3, %v1659_v13  ;;  %v1267_v14 = vmax.f32 %v1235_v12, 0.0  ;;  %v1238_v30 = vadd.f32 %v2091_v29, %v1199_v26  ;;  %v1197_v15 = vadd.f32 %v1144_v61, %v813_v60  ;;  %v834_v62 = vadd.f32 %v1787_v28, %v2074_v18 }
 0x12e   : > { %v1157_v31 = vpop.f32.mrf.mxu0  ;;  %v1664_v3 = vpack.c.bf16 %v1269_v27, %v1269_v27  ;;  %v825_v32 = vpop.f32.mrf.mxu1 }
 0x12f   : > { %v1662_v33 = vpack.c.bf16 %v1267_v14, %v1267_v14  ;;  %v1270_v34 = vmax.f32 %v1238_v30, 0.0  ;;  %v1236_v16 = vadd.f32 %v2091_v29, %v1197_v15  ;;  %v1202_v35 = vadd.f32 %v1821_v1, %v834_v62 }
 0x130   : > { %1430 = vst.msk [vmem:[%s2099_s29 + $0x68] sm:$0xf] %vm1403_vm3, %v1664_v3  ;;  %v826_v36 = vadd.f32 %v825_v32, %v2078_v20  ;;  %v1788_v5 = vpop.f32.mrf.mxu1  ;;  %v1822_v0 = vpop.f32.mrf.mxu0 }
 0x131   : > { %1428 = vst.msk [vmem:[%s2099_s29 + $0x60] sm:$0xf] %vm1403_vm3, %v1662_v33  ;;  %v1665_v17 = vpack.c.bf16 %v1270_v34, %v1270_v34  ;;  %v1268_v18 = vmax.f32 %v1236_v16, 0.0  ;;  %v1241_v37 = vadd.f32 %v2091_v29, %v1202_v35  ;;  %v837_v38 = vadd.f32 %v1788_v5, %v2082_v22 }
 0x132   : > { %v1200_v39 = vadd.f32 %v1157_v31, %v826_v36  ;;  %v828_v2 = vpop.f32.mrf.mxu1  ;;  %v1160_v43 = vpop.f32.mrf.mxu0 }
 0x133   : > { %1431 = vst.msk [vmem:[%s2099_s29 + $0x6c] sm:$0xf] %vm1403_vm3, %v1665_v17  ;;  %v1663_v40 = vpack.c.bf16 %v1268_v18, %v1268_v18  ;;  %v1273_v41 = vmax.f32 %v1241_v37, 0.0  ;;  %v1203_v20 = vadd.f32 %v1822_v0, %v837_v38  ;;  %v829_v19 = vadd.f32 %v828_v2, %v2086_v24 }
 0x134   : > { %v1239_v42 = vadd.f32 %v2091_v29, %v1200_v39 }
 0x135   : > { %1429 = vst.msk [vmem:[%s2099_s29 + $0x64] sm:$0xf] %vm1403_vm3, %v1663_v40  ;;  %v1668_v4 = vpack.c.bf16 %v1273_v41, %v1273_v41  ;;  %v1242_v22 = vadd.f32 %v2091_v29, %v1203_v20  ;;  %v1201_v44 = vadd.f32 %v1160_v43, %v829_v19 }
 0x136   : > { %v1271_v7 = vmax.f32 %v1239_v42, 0.0 }
 0x137   : > { %1434 = vst.msk [vmem:[%s2099_s29 + $0x78] sm:$0xf] %vm1403_vm3, %v1668_v4  ;;  %v1274_v45 = vmax.f32 %v1242_v22, 0.0  ;;  %v1240_v46 = vadd.f32 %v2091_v29, %v1201_v44 }
 0x138   : > { %v1666_v47 = vpack.c.bf16 %v1271_v7, %v1271_v7 }
 0x139   : > { %v1669_v48 = vpack.c.bf16 %v1274_v45, %v1274_v45  ;;  %v1272_v21 = vmax.f32 %v1240_v46, 0.0 }
 0x13a   : > { %1432 = vst.msk [vmem:[%s2099_s29 + $0x70] sm:$0xf] %vm1403_vm3, %v1666_v47 }
 0x13b   : > { %1435 = vst.msk [vmem:[%s2099_s29 + $0x7c] sm:$0xf] %vm1403_vm3, %v1669_v48  ;;  %v1667_v24 = vpack.c.bf16 %v1272_v21, %v1272_v21 }
 0x13d   : > { %1433 = vst.msk [vmem:[%s2099_s29 + $0x74] sm:$0xf] %vm1403_vm3, %v1667_v24 }
 0x13e PF: > { %s13_s12 = sadd.s32 1, %s1892_s12  }
 0x13f   : > { %p10_p4 = scmp.ge.s32.totalorder %s13_s12, 4  }
 0x141   :  { %12 = sbr.rel (!%p10_p4) target bundleno = 1 (0x1), region = 64 }

// kernel: faster_rcnn_forward.7
= control target key start
LH: loop header
LB: loop body
LE: loop exit
PB: predicated region body
PF: predicated region fallthrough
CT: control target
= control target key end

     0   :  { %s889_s12 = smov 0   ;;  %s984_s0 = inlined_call_operand.vmem [shape: bf16[2,144,48], index: 0, kind: input, shape index: {}]   ;;  %s985_s1 = inlined_call_operand.vmem [shape: bf16[3,48,32], index: 1, kind: input, shape index: {}]   ;;  %s986_s2 = inlined_call_operand.vmem [shape: f32[1,32], index: 2, kind: input, shape index: {}]   ;;  %s987_s3 = inlined_call_operand.vmem [shape: bf16[2,64,32], index: 3, kind: output, shape index: {}]  }
   0x1 LB: > { %s689_s13 = sadd.s32 4294967295, %s867_s12   ;;  %p693_p0 = scmp.ge.s32.totalorder %s867_s12, 1  ;;  %s867_s12 = sphi %s889_s12, %s13_s12  }
   0x2   : > { %p137_p1 = scmp.lt.s32.totalorder %s867_s12, 3 }
   0x4   : > { %p138_p2 = pnand %p693_p0, %p137_p1 }
   0x5   : > { %p161_p3 = scmp.lt.s32.totalorder (!%p138_p2), %s689_s13, 1 }
   0x6   : > { %141 = sbr.rel (%p138_p2) target bundleno = 249 (0xf9), region = 32 }
   0xb   : > { %v840_v0 = vld [vmem:[%s985_s1 + $0x28] sm:$0xff]   ;;  %v841_v1 = vld [vmem:[%s985_s1 + $0x10] sm:$0xff]   ;;  %v842_v2 = vld [vmem:[%s985_s1 + $0x20] sm:$0xff]   ;;  %s989_s13 = smov (!%p161_p3, %s689_s13), 1  ;;  %vm239_vm0 = vcmask 392192   ;;  %vm625_vm1 = vcmask 257024  }
   0xc   : > { %783 = vmatprep.subr.bf16.mxu0 %v840_v0  ;;  %797 = vmatprep.subr.bf16.mxu1 %v841_v1  ;;  %v843_v3 = vld [vmem:[%s985_s1 + $0x8] sm:$0xff]   ;;  %v844_v4 = vld [vmem:[%s985_s1 + $0x18] sm:$0xff]   ;;  %s831_s24 = smul.u32 72, %s989_s13  ;;  %v845_v5 = vld [vmem:[%s985_s1] sm:$0xff]   ;;  %s753_s11 = sshll.u32 %s989_s13, 5 }
   0xd   : > { %784 = vmatpush3.bf16.msra.mxu0 %v840_v0  ;;  %798 = vmatpush3.bf16.msra.mxu1 %v841_v1  ;;  %v850_v6 = vld [vmem:[%s985_s1 + $0x40] sm:$0xff]   ;;  %v851_v11 = vld [vmem:[%s985_s1 + $0x38] sm:$0xff]   ;;  %v856_v14 = vld [vmem:[%s985_s1 + $0x30] sm:$0xff]   ;;  %s963_s16 = scalar_lea.vmem %s987_s3, %s753_s11 }
   0xe   : > { %785 = vmatprep.subr.bf16.mxu0 %v842_v2  ;;  %799 = vmatprep.subr.bf16.mxu1 %v843_v3  ;;  %s921_s29 = scalar_lea.vmem %s984_s0, %s831_s24  ;;  %v742_v40 = vld [vmem:[%s986_s2] ss:$0 sm:$0xff] }
   0xf   : > { %v846_v7 = vld [vmem:[%s921_s29 + $0x24] sm:$0xff]   ;;  %v848_v9 = vld [vmem:[%s921_s29 + $0x2c] sm:$0xff]   ;;  %v852_v12 = vld [vmem:[%s921_s29 + $0x34] sm:$0xff]  }
  0x10   : > { %v847_v8 = vld [vmem:[%s921_s29] sm:$0xff]   ;;  %789 = vmatprep.mubr.msk.bf16.mxu0 %vm239_vm0, %v846_v7  ;;  %v849_v10 = vld [vmem:[%s921_s29 + $0x8] sm:$0xff]   ;;  %v853_v13 = vld [vmem:[%s921_s29 + $0x10] sm:$0xff]  }
  0x11   : > { %786 = vmatpush3.bf16.msra.mxu0 %v842_v2  ;;  %800 = vmatpush3.bf16.msra.mxu1 %v843_v3  ;;  %v854_v15 = vld [vmem:[%s921_s29 + $0x3c] sm:$0xff]   ;;  %v857_v17 = vld [vmem:[%s921_s29 + $0x4] sm:$0xff]   ;;  %v858_v18 = vld [vmem:[%s921_s29 + $0x14] sm:$0xff]  }
  0x12   : > { %787 = vmatprep.subr.bf16.mxu0 %v844_v4  ;;  %801 = vmatprep.subr.bf16.mxu1 %v845_v5  ;;  %v855_v16 = vld [vmem:[%s921_s29 + $0x18] sm:$0xff]   ;;  %v859_v19 = vld [vmem:[%s921_s29 + $0xc] sm:$0xff]  }
  0x13   : > { %803 = vmatprep.mubr.msk.bf16.mxu1 %vm239_vm0, %v847_v8  ;;  %v860_v20 = vld [vmem:[%s921_s29 + $0x1c] sm:$0xff]  }
  0x15   : > { %788 = vmatpush3.bf16.msra.mxu0 %v844_v4  ;;  %802 = vmatpush3.bf16.msra.mxu1 %v845_v5 }
  0x16   : > { %811 = vmatprep.subr.bf16.mxu0 %v850_v6  ;;  %825 = vmatprep.subr.bf16.mxu1 %v850_v6 }
  0x18   : > { %790 = vmatmul.mubr.msk.bf16.vlgmr.msra.gmra.mxu0 %vm239_vm0, %v848_v9  ;;  %804 = vmatmul.mubr.msk.bf16.vlgmr.msra.gmra.mxu1 %vm239_vm0, %v849_v10 }
  0x19   : > { %812 = vmatpush3.bf16.msra.mxu0 %v850_v6  ;;  %828 = vmatpush3.bf16.msra.mxu1 %v850_v6 }
  0x1a   : > { %813 = vmatprep.subr.bf16.mxu0 %v851_v11  ;;  %826 = vmatprep.subr.bf16.mxu1 %v851_v11 }
  0x1b   : > { %793 = vmatprep.mubr.msk.bf16.mxu0 %vm239_vm0, %v852_v12  ;;  %807 = vmatprep.mubr.msk.bf16.mxu1 %vm239_vm0, %v853_v13 }
  0x1d   : > { %814 = vmatpush3.bf16.msra.mxu0 %v851_v11  ;;  %829 = vmatpush3.bf16.msra.mxu1 %v851_v11 }
  0x1e   : > { %815 = vmatprep.subr.bf16.mxu0 %v856_v14  ;;  %827 = vmatprep.subr.bf16.mxu1 %v856_v14 }
  0x20   : > { %794 = vmatmul.mubr.msk.bf16.gmra.mxu0 %vm239_vm0, %v854_v15  ;;  %808 = vmatmul.mubr.msk.bf16.gmra.mxu1 %vm239_vm0, %v855_v16 }
  0x21   : > { %816 = vmatpush3.bf16.msra.mxu0 %v856_v14  ;;  %830 = vmatpush3.bf16.msra.mxu1 %v856_v14 }
  0x22   : > { %817 = vmatprep.mubr.msk.bf16.mxu0 %vm239_vm0, %v857_v17  ;;  %821 = vmatprep.mubr.msk.bf16.mxu1 %vm239_vm0, %v858_v18 }
  0x28   : > { %818 = vmatmul.mubr.msk.bf16.vlgmr.msra.gmra.mxu0 %vm239_vm0, %v859_v19  ;;  %822 = vmatmul.mubr.msk.bf16.vlgmr.msra.gmra.mxu1 %vm239_vm0, %v860_v20 }
  0xd8   : > { %v791_v21 = vpop.f32.mrf.mxu0  ;;  %v805_v22 = vpop.f32.mrf.mxu1 }
  0xd9   : > { %v410_v36 = vadd.f32 %v805_v22, %v791_v21 }
  0xda   : > { %v286_v23 = vpop.f32.mrf.mxu0  ;;  %v401_v24 = vpop.f32.mrf.mxu1 }
  0xdb   : > { %v402_v41 = vadd.f32 %v401_v24, %v286_v23 }
  0xdc   : > { %v792_v25 = vpop.f32.mrf.mxu0  ;;  %v806_v26 = vpop.f32.mrf.mxu1 }
  0xdd   : > { %v413_v47 = vadd.f32 %v806_v26, %v792_v25 }
  0xde   : > { %v289_v27 = vpop.f32.mrf.mxu0  ;;  %v404_v28 = vpop.f32.mrf.mxu1 }
  0xdf   : > { %v405_v55 = vadd.f32 %v404_v28, %v289_v27 }
  0xe0   : > { %v795_v29 = vpop.f32.mrf.mxu0  ;;  %v809_v30 = vpop.f32.mrf.mxu1 }
  0xe1   : > { %v426_v38 = vadd.f32 %v809_v30, %v795_v29 }
  0xe2   : > { %v302_v31 = vpop.f32.mrf.mxu0  ;;  %v417_v32 = vpop.f32.mrf.mxu1 }
  0xe3   : > { %v418_v44 = vadd.f32 %v417_v32, %v302_v31 }
  0xe4   : > { %v796_v33 = vpop.f32.mrf.mxu0  ;;  %v810_v34 = vpop.f32.mrf.mxu1 }
  0xe5   : > { %v429_v51 = vadd.f32 %v810_v34, %v796_v33 }
  0xe6   : > { %v305_v35 = vpop.f32.mrf.mxu0  ;;  %v420_v37 = vpop.f32.mrf.mxu1 }
  0xe7   : > { %v421_v60 = vadd.f32 %v420_v37, %v305_v35 }
  0xe8   : > { %v819_v39 = vpop.f32.mrf.mxu0  ;;  %v823_v43 = vpop.f32.mrf.mxu1 }
  0xe9   : > { %v564_v42 = vadd.f32 %v819_v39, %v410_v36  ;;  %v568_v45 = vadd.f32 %v823_v43, %v426_v38 }
  0xea   : > { %v531_v46 = vpop.f32.mrf.mxu0  ;;  %v547_v50 = vpop.f32.mrf.mxu1 }
  0xeb   : > { %v579_v48 = vadd.f32 %v742_v40, %v564_v42  ;;  %v562_v49 = vadd.f32 %v531_v46, %v402_v41  ;;  %v583_v52 = vadd.f32 %v742_v40, %v568_v45  ;;  %v566_v53 = vadd.f32 %v547_v50, %v418_v44 }
  0xec   : > { %v820_v54 = vpop.f32.mrf.mxu0  ;;  %v824_v59 = vpop.f32.mrf.mxu1 }
  0xed   : > { %v587_v56 = vmax.f32 %v579_v48, 0.0  ;;  %v577_v57 = vadd.f32 %v742_v40, %v562_v49  ;;  %v565_v58 = vadd.f32 %v820_v54, %v413_v47  ;;  %v591_v61 = vmax.f32 %v583_v52, 0.0 }
  0xee   : > { %v581_v62 = vadd.f32 %v742_v40, %v566_v53  ;;  %v569_v63 = vadd.f32 %v824_v59, %v429_v51  ;;  %v534_v0 = vpop.f32.mrf.mxu0  ;;  %v550_v5 = vpop.f32.mrf.mxu1 }
  0xef   : > { %v756_v1 = vpack.c.bf16 %v587_v56, %v587_v56  ;;  %v585_v2 = vmax.f32 %v577_v57, 0.0  ;;  %v580_v3 = vadd.f32 %v742_v40, %v565_v58  ;;  %v563_v4 = vadd.f32 %v534_v0, %v405_v55 }
  0xf0   : > { %v760_v6 = vpack.c.bf16 %v591_v61, %v591_v61  ;;  %v589_v7 = vmax.f32 %v581_v62, 0.0  ;;  %v584_v8 = vadd.f32 %v742_v40, %v569_v63  ;;  %v567_v9 = vadd.f32 %v550_v5, %v421_v60 }
  0xf1   : > { %628 = vst.msk [vmem:[%s963_s16 + $0x8] sm:$0xf] %vm625_vm1, %v756_v1  ;;  %v754_v10 = vpack.c.bf16 %v585_v2, %v585_v2  ;;  %v588_v11 = vmax.f32 %v580_v3, 0.0  ;;  %v578_v12 = vadd.f32 %v742_v40, %v563_v4 }
  0xf2   : > { %632 = vst.msk [vmem:[%s963_s16 + $0x18] sm:$0xf] %vm625_vm1, %v760_v6  ;;  %v758_v13 = vpack.c.bf16 %v589_v7, %v589_v7  ;;  %v592_v14 = vmax.f32 %v584_v8, 0.0  ;;  %v582_v15 = vadd.f32 %v742_v40, %v567_v9 }
  0xf3   : > { %626 = vst.msk [vmem:[%s963_s16] sm:$0xf] %vm625_vm1, %v754_v10  ;;  %v757_v16 = vpack.c.bf16 %v588_v11, %v588_v11  ;;  %v586_v17 = vmax.f32 %v578_v12, 0.0 }
  0xf4   : > { %630 = vst.msk [vmem:[%s963_s16 + $0x10] sm:$0xf] %vm625_vm1, %v758_v13  ;;  %v761_v18 = vpack.c.bf16 %v592_v14, %v592_v14  ;;  %v590_v19 = vmax.f32 %v582_v15, 0.0 }
  0xf5   : > { %629 = vst.msk [vmem:[%s963_s16 + $0xc] sm:$0xf] %vm625_vm1, %v757_v16  ;;  %v755_v20 = vpack.c.bf16 %v586_v17, %v586_v17 }
  0xf6   : > { %633 = vst.msk [vmem:[%s963_s16 + $0x1c] sm:$0xf] %vm625_vm1, %v761_v18  ;;  %v759_v21 = vpack.c.bf16 %v590_v19, %v590_v19 }
  0xf7   : > { %627 = vst.msk [vmem:[%s963_s16 + $0x4] sm:$0xf] %vm625_vm1, %v755_v20 }
  0xf8   : > { %631 = vst.msk [vmem:[%s963_s16 + $0x14] sm:$0xf] %vm625_vm1, %v759_v21 }
  0xf9 PF: > { %s13_s12 = sadd.s32 1, %s867_s12  }
  0xfa   : > { %p10_p4 = scmp.ge.s32.totalorder %s13_s12, 4  }
  0xfc   :  { %12 = sbr.rel (!%p10_p4) target bundleno = 1 (0x1), region = 64 }

// kernel: faster_rcnn_forward.8
= control target key start
LH: loop header
LB: loop body
LE: loop exit
PB: predicated region body
PF: predicated region fallthrough
CT: control target
= control target key end

     0   :  { %s1003_s12 = smov 0   ;;  %s1126_s0 = inlined_call_operand.vmem [shape: bf16[2,80,96], index: 0, kind: input, shape index: {}]   ;;  %s1127_s1 = inlined_call_operand.vmem [shape: bf16[3,96,32], index: 1, kind: input, shape index: {}]   ;;  %s1128_s2 = inlined_call_operand.vmem [shape: f32[1,32], index: 2, kind: input, shape index: {}]   ;;  %s1129_s3 = inlined_call_operand.vmem [shape: bf16[2,64,32], index: 3, kind: output, shape index: {}]  }
   0x1 LB: > { %s740_s13 = sadd.s32 4294967295, %s981_s12   ;;  %p744_p0 = scmp.ge.s32.totalorder %s981_s12, 1  ;;  %s981_s12 = sphi %s1003_s12, %s13_s12  }
   0x2   : > { %p137_p1 = scmp.lt.s32.totalorder %s981_s12, 3 }
   0x4   : > { %p138_p2 = pnand %p744_p0, %p137_p1 }
   0x5   : > { %p161_p3 = scmp.lt.s32.totalorder (!%p138_p2), %s740_s13, 1 }
   0x6   : > { %141 = sbr.rel (%p138_p2) target bundleno = 269 (0x10d), region = 32 }
   0xb   : > { %v945_v0 = vld [vmem:[%s1127_s1 + $0x58] sm:$0xff]   ;;  %v946_v1 = vld [vmem:[%s1127_s1 + $0x28] sm:$0xff]   ;;  %v947_v2 = vld [vmem:[%s1127_s1 + $0x50] sm:$0xff]   ;;  %s1131_s13 = smov (!%p161_p3, %s740_s13), 1  ;;  %vm262_vm0 = vcmask 785408   ;;  %vm676_vm1 = vcmask 257024  }
   0xc   : > { %864 = vmatprep.subr.bf16.mxu0 %v945_v0  ;;  %884 = vmatprep.subr.bf16.mxu1 %v946_v1  ;;  %v948_v3 = vld [vmem:[%s1127_s1 + $0x20] sm:$0xff]   ;;  %v949_v4 = vld [vmem:[%s1127_s1 + $0x48] sm:$0xff]   ;;  %v950_v5 = vld [vmem:[%s1127_s1 + $0x18] sm:$0xff]   ;;  %s936_s26 = smul.u32 40, %s1131_s13  ;;  %s825_s4 = sshll.u32 %s1131_s13, 5 }
   0xd   : > { %865 = vmatpush3.bf16.msra.mxu0 %v945_v0  ;;  %885 = vmatpush3.bf16.msra.mxu1 %v946_v1  ;;  %v951_v6 = vld [vmem:[%s1127_s1 + $0x40] sm:$0xff]   ;;  %v952_v7 = vld [vmem:[%s1127_s1 + $0x10] sm:$0xff]   ;;  %v953_v8 = vld [vmem:[%s1127_s1 + $0x38] sm:$0xff]   ;;  %s1105_s7 = scalar_lea.vmem %s1129_s3, %s825_s4 }
   0xe   : > { %866 = vmatprep.subr.bf16.mxu0 %v947_v2  ;;  %886 = vmatprep.subr.bf16.mxu1 %v948_v3  ;;  %s1041_s6 = scalar_lea.vmem %s1126_s0, %s936_s26  ;;  %v954_v11 = vld [vmem:[%s1127_s1 + $0x8] sm:$0xff]   ;;  %v955_v15 = vld [vmem:[%s1127_s1 + $0x30] sm:$0xff]   ;;  %v956_v16 = vld [vmem:[%s1127_s1] sm:$0xff]  }
   0xf   : > { %v173_v9 = vld [vmem:[%s1041_s6 + $0x4] sm:$0xf]  ;;  %v174_v10 = vld [vmem:[%s1041_s6 + $0x8] sm:$0xf]  ;;  %v172_v13 = vld [vmem:[%s1041_s6] sm:$0xf] }
  0x10   : > { %v760_v12 = vcombine.low %v173_v9, %v174_v10  ;;  %v774_v14 = vcombine.low %v172_v13, %v173_v9  ;;  %v175_v17 = vld [vmem:[%s1041_s6 + $0xc] sm:$0xf]  ;;  %v176_v18 = vld [vmem:[%s1041_s6 + $0x10] sm:$0xf]  ;;  %v177_v20 = vld [vmem:[%s1041_s6 + $0x14] sm:$0xf] }
  0x11   : > { %867 = vmatpush3.bf16.msra.mxu0 %v947_v2  ;;  %887 = vmatpush3.bf16.msra.mxu1 %v948_v3  ;;  %v961_v19 = vld [vmem:[%s1127_s1 + $0x88] sm:$0xff]   ;;  %v761_v21 = vcombine.low %v175_v17, %v176_v18  ;;  %v178_v22 = vld [vmem:[%s1041_s6 + $0x18] sm:$0xf]  ;;  %v775_v23 = vcombine.low %v174_v10, %v175_v17  ;;  %v962_v24 = vld [vmem:[%s1127_s1 + $0x80] sm:$0xff]   ;;  %v776_v26 = vcombine.low %v176_v18, %v177_v20 }
  0x12   : > { %868 = vmatprep.subr.bf16.mxu0 %v949_v4  ;;  %888 = vmatprep.subr.bf16.mxu1 %v950_v5  ;;  %v762_v25 = vcombine.low %v177_v20, %v178_v22  ;;  %v179_v27 = vld [vmem:[%s1041_s6 + $0x1c] sm:$0xf]  ;;  %v192_v28 = vld [vmem:[%s1041_s6 + $0x20] sm:$0xf]  ;;  %v968_v32 = vld [vmem:[%s1127_s1 + $0x70] sm:$0xff]  }
  0x13   : > { %876 = vmatprep.mubr.msk.bf16.mxu0 %vm262_vm0, %v760_v12  ;;  %896 = vmatprep.mubr.msk.bf16.mxu1 %vm262_vm0, %v774_v14  ;;  %v963_v29 = vld [vmem:[%s1127_s1 + $0x78] sm:$0xff]   ;;  %v763_v30 = vcombine.low %v179_v27, %v192_v28  ;;  %v777_v31 = vcombine.low %v178_v22, %v179_v27  ;;  %v971_v33 = vld [vmem:[%s1041_s6 + $0x8] sm:$0xff]   ;;  %v970_v36 = vld [vmem:[%s1127_s1 + $0x60] sm:$0xff]  }
  0x14   : > { %v972_v34 = vld [vmem:[%s1041_s6 + $0x18] sm:$0xff]   ;;  %v969_v35 = vld [vmem:[%s1127_s1 + $0x68] sm:$0xff]   ;;  %v973_v37 = vld [vmem:[%s1041_s6 + $0x10] sm:$0xff]  }
  0x15   : > { %869 = vmatpush3.bf16.msra.mxu0 %v949_v4  ;;  %889 = vmatpush3.bf16.msra.mxu1 %v950_v5  ;;  %v974_v38 = vld [vmem:[%s1041_s6 + $0x20] sm:$0xff]  }
  0x16   : > { %870 = vmatprep.subr.bf16.mxu0 %v951_v6  ;;  %890 = vmatprep.subr.bf16.mxu1 %v952_v7  ;;  %v814_v58 = vld [vmem:[%s1128_s2] ss:$0 sm:$0xff] }
  0x19   : > { %871 = vmatpush3.bf16.msra.mxu0 %v951_v6  ;;  %891 = vmatpush3.bf16.msra.mxu1 %v952_v7 }
  0x1a   : > { %872 = vmatprep.subr.bf16.mxu0 %v953_v8  ;;  %892 = vmatprep.subr.bf16.mxu1 %v954_v11 }
  0x1d   : > { %873 = vmatpush3.bf16.msra.mxu0 %v953_v8  ;;  %893 = vmatpush3.bf16.msra.mxu1 %v954_v11 }
  0x1e   : > { %874 = vmatprep.subr.bf16.mxu0 %v955_v15  ;;  %894 = vmatprep.subr.bf16.mxu1 %v956_v16 }
  0x21   : > { %875 = vmatpush3.bf16.msra.mxu0 %v955_v15  ;;  %895 = vmatpush3.bf16.msra.mxu1 %v956_v16 }
  0x22   : > { %904 = vmatprep.subr.bf16.mxu0 %v961_v19  ;;  %924 = vmatprep.subr.bf16.mxu1 %v961_v19 }
  0x24   : > { %877 = vmatmul.mubr.msk.bf16.vlgmr.msra.gmra.mxu0 %vm262_vm0, %v761_v21  ;;  %897 = vmatmul.mubr.msk.bf16.vlgmr.msra.gmra.mxu1 %vm262_vm0, %v775_v23 }
  0x25   : > { %905 = vmatpush3.bf16.msra.mxu0 %v961_v19  ;;  %930 = vmatpush3.bf16.msra.mxu1 %v961_v19 }
  0x26   : > { %906 = vmatprep.subr.bf16.mxu0 %v962_v24  ;;  %925 = vmatprep.subr.bf16.mxu1 %v962_v24 }
  0x27   : > { %880 = vmatprep.mubr.msk.bf16.mxu0 %vm262_vm0, %v762_v25  ;;  %900 = vmatprep.mubr.msk.bf16.mxu1 %vm262_vm0, %v776_v26 }
  0x29   : > { %907 = vmatpush3.bf16.msra.mxu0 %v962_v24  ;;  %931 = vmatpush3.bf16.msra.mxu1 %v962_v24 }
  0x2a   : > { %908 = vmatprep.subr.bf16.mxu0 %v963_v29  ;;  %926 = vmatprep.subr.bf16.mxu1 %v963_v29 }
  0x2c   : > { %881 = vmatmul.mubr.msk.bf16.gmra.mxu0 %vm262_vm0, %v763_v30  ;;  %901 = vmatmul.mubr.msk.bf16.gmra.mxu1 %vm262_vm0, %v777_v31 }
  0x2d   : > { %909 = vmatpush3.bf16.msra.mxu0 %v963_v29  ;;  %932 = vmatpush3.bf16.msra.mxu1 %v963_v29 }
  0x2e   : > { %910 = vmatprep.subr.bf16.mxu0 %v968_v32  ;;  %927 = vmatprep.subr.bf16.mxu1 %v968_v32 }
  0x2f   : > { %916 = vmatprep.mubr.msk.bf16.mxu0 %vm262_vm0, %v971_v33  ;;  %920 = vmatprep.mubr.msk.bf16.mxu1 %vm262_vm0, %v972_v34 }
  0x31   : > { %911 = vmatpush3.bf16.msra.mxu0 %v968_v32  ;;  %933 = vmatpush3.bf16.msra.mxu1 %v968_v32 }
  0x32   : > { %912 = vmatprep.subr.bf16.mxu0 %v969_v35  ;;  %928 = vmatprep.subr.bf16.mxu1 %v969_v35 }
  0x35   : > { %913 = vmatpush3.bf16.msra.mxu0 %v969_v35  ;;  %934 = vmatpush3.bf16.msra.mxu1 %v969_v35 }
  0x36   : > { %914 = vmatprep.subr.bf16.mxu0 %v970_v36  ;;  %929 = vmatprep.subr.bf16.mxu1 %v970_v36 }
  0x39   : > { %915 = vmatpush3.bf16.msra.mxu0 %v970_v36  ;;  %935 = vmatpush3.bf16.msra.mxu1 %v970_v36 }
  0x3c   : > { %917 = vmatmul.mubr.msk.bf16.vlgmr.msra.gmra.mxu0 %vm262_vm0, %v973_v37  ;;  %921 = vmatmul.mubr.msk.bf16.vlgmr.msra.gmra.mxu1 %vm262_vm0, %v974_v38 }
  0xe4   : > { %v878_v39 = vpop.f32.mrf.mxu0  ;;  %v898_v40 = vpop.f32.mrf.mxu1 }
  0xe5   : > { %v437_v54 = vadd.f32 %v898_v40, %v878_v39 }
  0xe6   : > { %v309_v41 = vpop.f32.mrf.mxu0  ;;  %v428_v42 = vpop.f32.mrf.mxu1 }
  0xe7   : > { %v429_v59 = vadd.f32 %v428_v42, %v309_v41 }
  0xe8   : > { %v879_v43 = vpop.f32.mrf.mxu0  ;;  %v899_v44 = vpop.f32.mrf.mxu1 }
  0xe9   : > { %v440_v1 = vadd.f32 %v899_v44, %v879_v43 }
  0xea   : > { %v312_v45 = vpop.f32.mrf.mxu0  ;;  %v431_v46 = vpop.f32.mrf.mxu1 }
  0xeb   : > { %v432_v9 = vadd.f32 %v431_v46, %v312_v45 }
  0xec   : > { %v882_v47 = vpop.f32.mrf.mxu0  ;;  %v902_v48 = vpop.f32.mrf.mxu1 }
  0xed   : > { %v453_v56 = vadd.f32 %v902_v48, %v882_v47 }
  0xee   : > { %v325_v49 = vpop.f32.mrf.mxu0  ;;  %v444_v50 = vpop.f32.mrf.mxu1 }
  0xef   : > { %v445_v62 = vadd.f32 %v444_v50, %v325_v49 }
  0xf0   : > { %v883_v51 = vpop.f32.mrf.mxu0  ;;  %v903_v52 = vpop.f32.mrf.mxu1 }
  0xf1   : > { %v456_v5 = vadd.f32 %v903_v52, %v883_v51 }
  0xf2   : > { %v328_v53 = vpop.f32.mrf.mxu0  ;;  %v447_v55 = vpop.f32.mrf.mxu1 }
  0xf3   : > { %v448_v14 = vadd.f32 %v447_v55, %v328_v53 }
  0xfc   : > { %v918_v57 = vpop.f32.mrf.mxu0  ;;  %v922_v61 = vpop.f32.mrf.mxu1 }
  0xfd   : > { %v615_v60 = vadd.f32 %v918_v57, %v437_v54  ;;  %v619_v63 = vadd.f32 %v922_v61, %v453_v56 }
  0xfe   : > { %v582_v0 = vpop.f32.mrf.mxu0  ;;  %v598_v4 = vpop.f32.mrf.mxu1 }
  0xff   : > { %v630_v2 = vadd.f32 %v814_v58, %v615_v60  ;;  %v613_v3 = vadd.f32 %v582_v0, %v429_v59  ;;  %v634_v6 = vadd.f32 %v814_v58, %v619_v63  ;;  %v617_v7 = vadd.f32 %v598_v4, %v445_v62 }
 0x100   : > { %v919_v8 = vpop.f32.mrf.mxu0  ;;  %v923_v13 = vpop.f32.mrf.mxu1 }
 0x101   : > { %v638_v10 = vmax.f32 %v630_v2, 0.0  ;;  %v628_v11 = vadd.f32 %v814_v58, %v613_v3  ;;  %v616_v12 = vadd.f32 %v919_v8, %v440_v1  ;;  %v642_v15 = vmax.f32 %v634_v6, 0.0 }
 0x102   : > { %v632_v16 = vadd.f32 %v814_v58, %v617_v7  ;;  %v620_v17 = vadd.f32 %v923_v13, %v456_v5  ;;  %v585_v18 = vpop.f32.mrf.mxu0  ;;  %v601_v23 = vpop.f32.mrf.mxu1 }
 0x103   : > { %v828_v19 = vpack.c.bf16 %v638_v10, %v638_v10  ;;  %v636_v20 = vmax.f32 %v628_v11, 0.0  ;;  %v631_v21 = vadd.f32 %v814_v58, %v616_v12  ;;  %v614_v22 = vadd.f32 %v585_v18, %v432_v9 }
 0x104   : > { %v832_v24 = vpack.c.bf16 %v642_v15, %v642_v15  ;;  %v640_v25 = vmax.f32 %v632_v16, 0.0  ;;  %v635_v26 = vadd.f32 %v814_v58, %v620_v17  ;;  %v618_v27 = vadd.f32 %v601_v23, %v448_v14 }
 0x105   : > { %679 = vst.msk [vmem:[%s1105_s7 + $0x8] sm:$0xf] %vm676_vm1, %v828_v19  ;;  %v826_v28 = vpack.c.bf16 %v636_v20, %v636_v20  ;;  %v639_v29 = vmax.f32 %v631_v21, 0.0  ;;  %v629_v30 = vadd.f32 %v814_v58, %v614_v22 }
 0x106   : > { %683 = vst.msk [vmem:[%s1105_s7 + $0x18] sm:$0xf] %vm676_vm1, %v832_v24  ;;  %v830_v31 = vpack.c.bf16 %v640_v25, %v640_v25  ;;  %v643_v32 = vmax.f32 %v635_v26, 0.0  ;;  %v633_v33 = vadd.f32 %v814_v58, %v618_v27 }
 0x107   : > { %677 = vst.msk [vmem:[%s1105_s7] sm:$0xf] %vm676_vm1, %v826_v28  ;;  %v829_v34 = vpack.c.bf16 %v639_v29, %v639_v29  ;;  %v637_v35 = vmax.f32 %v629_v30, 0.0 }
 0x108   : > { %681 = vst.msk [vmem:[%s1105_s7 + $0x10] sm:$0xf] %vm676_vm1, %v830_v31  ;;  %v833_v36 = vpack.c.bf16 %v643_v32, %v643_v32  ;;  %v641_v37 = vmax.f32 %v633_v33, 0.0 }
 0x109   : > { %680 = vst.msk [vmem:[%s1105_s7 + $0xc] sm:$0xf] %vm676_vm1, %v829_v34  ;;  %v827_v38 = vpack.c.bf16 %v637_v35, %v637_v35 }
 0x10a   : > { %684 = vst.msk [vmem:[%s1105_s7 + $0x1c] sm:$0xf] %vm676_vm1, %v833_v36  ;;  %v831_v39 = vpack.c.bf16 %v641_v37, %v641_v37 }
 0x10b   : > { %678 = vst.msk [vmem:[%s1105_s7 + $0x4] sm:$0xf] %vm676_vm1, %v827_v38 }
 0x10c   : > { %682 = vst.msk [vmem:[%s1105_s7 + $0x14] sm:$0xf] %vm676_vm1, %v831_v39 }
 0x10d PF: > { %s13_s12 = sadd.s32 1, %s981_s12  }
 0x10e   : > { %p10_p4 = scmp.ge.s32.totalorder %s13_s12, 4  }
 0x110   :  { %12 = sbr.rel (!%p10_p4) target bundleno = 1 (0x1), region = 64 }

// kernel: faster_rcnn_forward.9
= control target key start
LH: loop header
LB: loop body
LE: loop exit
PB: predicated region body
PF: predicated region fallthrough
CT: control target
= control target key end

     0   :  { %s501_s12 = smov 0   ;;  %s535_s0 = inlined_call_operand.vmem [shape: bf16[2,64,32], index: 0, kind: input, shape index: {}]   ;;  %s536_s1 = inlined_call_operand.vmem [shape: bf16[1,32,15], index: 1, kind: input, shape index: {}]   ;;  %s537_s2 = inlined_call_operand.vmem [shape: f32[1,15], index: 2, kind: input, shape index: {}]   ;;  %s538_s3 = inlined_call_operand.vmem [shape: bf16[2,64,15], index: 3, kind: output, shape index: {}]  }
   0x1 LB: > { %s397_s13 = sadd.s32 4294967295, %s479_s12   ;;  %p401_p0 = scmp.ge.s32.totalorder %s479_s12, 1  ;;  %s479_s12 = sphi %s501_s12, %s13_s12  }
   0x2   : > { %p137_p1 = scmp.lt.s32.totalorder %s479_s12, 3 }
   0x4   : > { %p138_p2 = pnand %p401_p0, %p137_p1 }
   0x5   : > { %p161_p3 = scmp.lt.s32.totalorder (!%p138_p2), %s397_s13, 1 }
   0x6   : > { %141 = sbr.rel (%p138_p2) target bundleno = 224 (0xe0), region = 32 }
   0xb   : > { %v467_v0 = vld [vmem:[%s536_s1 + $0x8] sm:$0xff]   ;;  %v468_v1 = vld [vmem:[%s536_s1] sm:$0xff]   ;;  %s540_s13 = smov (!%p161_p3, %s397_s13), 1  ;;  %vm223_vm0 = vcmask 261120   ;;  %vm333_vm1 = vcmask 117760  }
   0xc   : > { %443 = vmatprep.subr.bf16.mxu0 %v467_v0  ;;  %455 = vmatprep.subr.bf16.mxu1 %v467_v0  ;;  %s427_s18 = sshll.u32 %s540_s13, 5  ;;  %v406_v6 = vld [vmem:[%s537_s2] ss:$0 sm:$0xff] }
   0xd   : > { %444 = vmatpush3.bf16.msra.mxu0 %v467_v0  ;;  %457 = vmatpush3.bf16.msra.mxu1 %v467_v0  ;;  %s165_s21 = scalar_lea.vmem %s535_s0, %s427_s18  ;;  %s170_s26 = scalar_lea.vmem %s538_s3, %s427_s18 }
   0xe   : > { %445 = vmatprep.subr.bf16.mxu0 %v468_v1  ;;  %456 = vmatprep.subr.bf16.mxu1 %v468_v1  ;;  %v469_v2 = vld [vmem:[%s165_s21] sm:$0xff]   ;;  %v470_v3 = vld [vmem:[%s165_s21 + $0x10] sm:$0xff]   ;;  %v471_v4 = vld [vmem:[%s165_s21 + $0x8] sm:$0xff]  }
   0xf   : > { %447 = vmatprep.mubr.msk.bf16.mxu0 %vm223_vm0, %v469_v2  ;;  %451 = vmatprep.mubr.msk.bf16.mxu1 %vm223_vm0, %v470_v3  ;;  %v472_v5 = vld [vmem:[%s165_s21 + $0x18] sm:$0xff]  }
  0x11   : > { %446 = vmatpush3.bf16.msra.mxu0 %v468_v1  ;;  %458 = vmatpush3.bf16.msra.mxu1 %v468_v1 }
  0x14   : > { %448 = vmatmul.mubr.msk.bf16.vlgmr.msra.gmra.mxu0 %vm223_vm0, %v471_v4  ;;  %452 = vmatmul.mubr.msk.bf16.vlgmr.msra.gmra.mxu1 %vm223_vm0, %v472_v5 }
  0xd4   : > { %v449_v7 = vpop.f32.mrf.mxu0  ;;  %v453_v9 = vpop.f32.mrf.mxu1 }
  0xd5   : > { %v279_v8 = vadd.f32 %v449_v7, %v406_v6  ;;  %v295_v10 = vadd.f32 %v453_v9, %v406_v6 }
  0xd6   : > { %v270_v11 = vpop.f32.mrf.mxu0  ;;  %v286_v14 = vpop.f32.mrf.mxu1 }
  0xd7   : > { %v431_v12 = vpack.c.bf16 %v279_v8, %v279_v8  ;;  %v271_v13 = vadd.f32 %v406_v6, %v270_v11  ;;  %v435_v15 = vpack.c.bf16 %v295_v10, %v295_v10  ;;  %v287_v16 = vadd.f32 %v406_v6, %v286_v14 }
  0xd8   : > { %v450_v17 = vpop.f32.mrf.mxu0  ;;  %v454_v20 = vpop.f32.mrf.mxu1 }
  0xd9   : > { %336 = vst.msk [vmem:[%s170_s26 + $0x8] sm:$0xf] %vm333_vm1, %v431_v12  ;;  %v429_v18 = vpack.c.bf16 %v271_v13, %v271_v13  ;;  %v282_v19 = vadd.f32 %v450_v17, %v406_v6  ;;  %340 = vst.msk [vmem:[%s170_s26 + $0x18] sm:$0xf] %vm333_vm1, %v435_v15  ;;  %v433_v21 = vpack.c.bf16 %v287_v16, %v287_v16 }
  0xda   : > { %v298_v22 = vadd.f32 %v454_v20, %v406_v6  ;;  %v273_v23 = vpop.f32.mrf.mxu0  ;;  %v289_v26 = vpop.f32.mrf.mxu1 }
  0xdb   : > { %334 = vst.msk [vmem:[%s170_s26] sm:$0xf] %vm333_vm1, %v429_v18  ;;  %v432_v24 = vpack.c.bf16 %v282_v19, %v282_v19  ;;  %v274_v25 = vadd.f32 %v406_v6, %v273_v23  ;;  %338 = vst.msk [vmem:[%s170_s26 + $0x10] sm:$0xf] %vm333_vm1, %v433_v21  ;;  %v290_v28 = vadd.f32 %v406_v6, %v289_v26 }
  0xdc   : > { %v436_v27 = vpack.c.bf16 %v298_v22, %v298_v22 }
  0xdd   : > { %337 = vst.msk [vmem:[%s170_s26 + $0xc] sm:$0xf] %vm333_vm1, %v432_v24  ;;  %v430_v29 = vpack.c.bf16 %v274_v25, %v274_v25  ;;  %v434_v30 = vpack.c.bf16 %v290_v28, %v290_v28 }
  0xde   : > { %341 = vst.msk [vmem:[%s170_s26 + $0x1c] sm:$0xf] %vm333_vm1, %v436_v27 }
  0xdf   : > { %335 = vst.msk [vmem:[%s170_s26 + $0x4] sm:$0xf] %vm333_vm1, %v430_v29  ;;  %339 = vst.msk [vmem:[%s170_s26 + $0x14] sm:$0xf] %vm333_vm1, %v434_v30 }
  0xe0 PF: > { %s13_s12 = sadd.s32 1, %s479_s12  }
  0xe1   : > { %p10_p4 = scmp.ge.s32.totalorder %s13_s12, 4  }
  0xe3   :  { %12 = sbr.rel (!%p10_p4) target bundleno = 1 (0x1), region = 62 }

// kernel: faster_rcnn_forward.10
= control target key start
LH: loop header
LB: loop body
LE: loop exit
PB: predicated region body
PF: predicated region fallthrough
CT: control target
= control target key end

     0   :  { %s678_s9 = smov 0   ;;  %s758_s0 = inlined_call_operand.vmem [shape: bf16[2,128,64], index: 0, kind: input, shape index: {}]   ;;  %s759_s1 = inlined_call_operand.vmem [shape: bf16[2,64,32], index: 1, kind: input, shape index: {}]   ;;  %s760_s2 = inlined_call_operand.vmem [shape: bf16[2,128,32], index: 2, kind: output, shape index: {}]  }
   0x1 LB: > { %s523_s10 = sadd.s32 4294967295, %s661_s9   ;;  %p527_p0 = scmp.ge.s32.totalorder %s661_s9, 1  ;;  %s661_s9 = sphi %s678_s9, %s12_s9  }
   0x2   : > { %p122_p1 = scmp.lt.s32.totalorder %s661_s9, 3 }
   0x4   : > { %p123_p2 = pnand %p527_p0, %p122_p1 }
   0x5   : > { %p149_p3 = scmp.lt.s32.totalorder (!%p123_p2), %s523_s10, 1 }
   0x6   : > { %126 = sbr.rel (%p123_p2) target bundleno = 241 (0xf1), region = 28 }
   0xb   : > { %s762_s10 = smov (!%p149_p3, %s523_s10), 1  ;;  %vm253_vm0 = vcmask 523264   ;;  %vm439_vm1 = vcmask 257024  }
   0xc   : > { %s572_s11 = sshll.u32 %s762_s10, 6  ;;  %s573_s12 = sshll.u32 %s762_s10, 5 }
   0xd   : > { %s158_s15 = scalar_lea.vmem %s759_s1, %s573_s12  ;;  %s698_s18 = scalar_lea.vmem %s758_s0, %s572_s11 }
   0xe   : > { %v643_v0 = vld [vmem:[%s158_s15 + $0x18] sm:$0xff]   ;;  %v644_v1 = vld [vmem:[%s158_s15 + $0x10] sm:$0xff]   ;;  %v645_v2 = vld [vmem:[%s158_s15 + $0x8] sm:$0xff]   ;;  %s721_s21 = scalar_lea.vmem %s760_s2, %s572_s11 }
   0xf   : > { %603 = vmatprep.subr.bf16.mxu0 %v643_v0  ;;  %627 = vmatprep.subr.bf16.mxu1 %v643_v0  ;;  %v647_v3 = vld [vmem:[%s698_s18] sm:$0xff]   ;;  %v649_v6 = vld [vmem:[%s698_s18 + $0x8] sm:$0xff]   ;;  %v651_v8 = vld [vmem:[%s698_s18 + $0x10] sm:$0xff]  }
  0x10   : > { %604 = vmatpush3.bf16.msra.mxu0 %v643_v0  ;;  %631 = vmatpush3.bf16.msra.mxu1 %v643_v0  ;;  %v648_v4 = vld [vmem:[%s698_s18 + $0x20] sm:$0xff]   ;;  %v650_v7 = vld [vmem:[%s698_s18 + $0x28] sm:$0xff]   ;;  %v652_v9 = vld [vmem:[%s698_s18 + $0x30] sm:$0xff]  }
  0x11   : > { %605 = vmatprep.subr.bf16.mxu0 %v644_v1  ;;  %628 = vmatprep.subr.bf16.mxu1 %v644_v1  ;;  %v646_v5 = vld [vmem:[%s158_s15] sm:$0xff]   ;;  %v653_v10 = vld [vmem:[%s698_s18 + $0x18] sm:$0xff]  }
  0x12   : > { %611 = vmatprep.mubr.msk.bf16.mxu0 %vm253_vm0, %v647_v3  ;;  %619 = vmatprep.mubr.msk.bf16.mxu1 %vm253_vm0, %v648_v4  ;;  %v654_v11 = vld [vmem:[%s698_s18 + $0x38] sm:$0xff]  }
  0x14   : > { %606 = vmatpush3.bf16.msra.mxu0 %v644_v1  ;;  %632 = vmatpush3.bf16.msra.mxu1 %v644_v1 }
  0x15   : > { %607 = vmatprep.subr.bf16.mxu0 %v645_v2  ;;  %629 = vmatprep.subr.bf16.mxu1 %v645_v2 }
  0x18   : > { %608 = vmatpush3.bf16.msra.mxu0 %v645_v2  ;;  %633 = vmatpush3.bf16.msra.mxu1 %v645_v2 }
  0x19   : > { %609 = vmatprep.subr.bf16.mxu0 %v646_v5  ;;  %630 = vmatprep.subr.bf16.mxu1 %v646_v5 }
  0x1c   : > { %610 = vmatpush3.bf16.msra.mxu0 %v646_v5  ;;  %634 = vmatpush3.bf16.msra.mxu1 %v646_v5 }
  0x1f   : > { %612 = vmatmul.mubr.msk.bf16.vlgmr.msra.gmra.mxu0 %vm253_vm0, %v649_v6  ;;  %620 = vmatmul.mubr.msk.bf16.vlgmr.msra.gmra.mxu1 %vm253_vm0, %v650_v7 }
  0x20   : > { %615 = vmatprep.mubr.msk.bf16.mxu0 %vm253_vm0, %v651_v8  ;;  %623 = vmatprep.mubr.msk.bf16.mxu1 %vm253_vm0, %v652_v9 }
  0x27   : > { %616 = vmatmul.mubr.msk.bf16.gmra.mxu0 %vm253_vm0, %v653_v10  ;;  %624 = vmatmul.mubr.msk.bf16.gmra.mxu1 %vm253_vm0, %v654_v11 }
  0xdf   : > { %v613_v12 = vpop.f32.mrf.mxu0  ;;  %v621_v13 = vpop.f32.mrf.mxu1 }
  0xe0   : > { %v577_v14 = vpack.c.bf16 %v613_v12, %v613_v12  ;;  %v585_v15 = vpack.c.bf16 %v621_v13, %v621_v13 }
  0xe1   : > { %v312_v16 = vpop.f32.mrf.mxu0  ;;  %v344_v17 = vpop.f32.mrf.mxu1 }
  0xe2   : > { %442 = vst.msk [vmem:[%s721_s21 + $0x8] sm:$0xf] %vm439_vm1, %v577_v14  ;;  %450 = vst.msk [vmem:[%s721_s21 + $0x28] sm:$0xf] %vm439_vm1, %v585_v15  ;;  %v575_v18 = vpack.c.bf16 %v312_v16, %v312_v16  ;;  %v583_v19 = vpack.c.bf16 %v344_v17, %v344_v17 }
  0xe3   : > { %v614_v20 = vpop.f32.mrf.mxu0  ;;  %v622_v21 = vpop.f32.mrf.mxu1 }
  0xe4   : > { %440 = vst.msk [vmem:[%s721_s21] sm:$0xf] %vm439_vm1, %v575_v18  ;;  %448 = vst.msk [vmem:[%s721_s21 + $0x20] sm:$0xf] %vm439_vm1, %v583_v19  ;;  %v578_v22 = vpack.c.bf16 %v614_v20, %v614_v20  ;;  %v586_v23 = vpack.c.bf16 %v622_v21, %v622_v21 }
  0xe5   : > { %v315_v24 = vpop.f32.mrf.mxu0  ;;  %v347_v25 = vpop.f32.mrf.mxu1 }
  0xe6   : > { %443 = vst.msk [vmem:[%s721_s21 + $0xc] sm:$0xf] %vm439_vm1, %v578_v22  ;;  %451 = vst.msk [vmem:[%s721_s21 + $0x2c] sm:$0xf] %vm439_vm1, %v586_v23  ;;  %v576_v26 = vpack.c.bf16 %v315_v24, %v315_v24  ;;  %v584_v27 = vpack.c.bf16 %v347_v25, %v347_v25 }
  0xe7   : > { %v617_v28 = vpop.f32.mrf.mxu0  ;;  %v625_v29 = vpop.f32.mrf.mxu1 }
  0xe8   : > { %441 = vst.msk [vmem:[%s721_s21 + $0x4] sm:$0xf] %vm439_vm1, %v576_v26  ;;  %449 = vst.msk [vmem:[%s721_s21 + $0x24] sm:$0xf] %vm439_vm1, %v584_v27  ;;  %v581_v30 = vpack.c.bf16 %v617_v28, %v617_v28  ;;  %v589_v31 = vpack.c.bf16 %v625_v29, %v625_v29 }
  0xe9   : > { %v328_v32 = vpop.f32.mrf.mxu0  ;;  %v360_v33 = vpop.f32.mrf.mxu1 }
  0xea   : > { %446 = vst.msk [vmem:[%s721_s21 + $0x18] sm:$0xf] %vm439_vm1, %v581_v30  ;;  %454 = vst.msk [vmem:[%s721_s21 + $0x38] sm:$0xf] %vm439_vm1, %v589_v31  ;;  %v579_v34 = vpack.c.bf16 %v328_v32, %v328_v32  ;;  %v587_v35 = vpack.c.bf16 %v360_v33, %v360_v33 }
  0xeb   : > { %v618_v36 = vpop.f32.mrf.mxu0  ;;  %v626_v37 = vpop.f32.mrf.mxu1 }
  0xec   : > { %444 = vst.msk [vmem:[%s721_s21 + $0x10] sm:$0xf] %vm439_vm1, %v579_v34  ;;  %452 = vst.msk [vmem:[%s721_s21 + $0x30] sm:$0xf] %vm439_vm1, %v587_v35  ;;  %v582_v38 = vpack.c.bf16 %v618_v36, %v618_v36  ;;  %v590_v39 = vpack.c.bf16 %v626_v37, %v626_v37 }
  0xed   : > { %v331_v40 = vpop.f32.mrf.mxu0  ;;  %v363_v41 = vpop.f32.mrf.mxu1 }
  0xee   : > { %447 = vst.msk [vmem:[%s721_s21 + $0x1c] sm:$0xf] %vm439_vm1, %v582_v38  ;;  %455 = vst.msk [vmem:[%s721_s21 + $0x3c] sm:$0xf] %vm439_vm1, %v590_v39  ;;  %v580_v42 = vpack.c.bf16 %v331_v40, %v331_v40  ;;  %v588_v43 = vpack.c.bf16 %v363_v41, %v363_v41 }
  0xf0   : > { %445 = vst.msk [vmem:[%s721_s21 + $0x14] sm:$0xf] %vm439_vm1, %v580_v42  ;;  %453 = vst.msk [vmem:[%s721_s21 + $0x34] sm:$0xf] %vm439_vm1, %v588_v43 }
  0xf1 PF: > { %s12_s9 = sadd.s32 1, %s661_s9  }
  0xf2   : > { %p9_p4 = scmp.ge.s32.totalorder %s12_s9, 4  }
  0xf4   :  { %11 = sbr.rel (!%p9_p4) target bundleno = 1 (0x1), region = 61 }

// kernel: faster_rcnn_forward.11
= control target key start
LH: loop header
LB: loop body
LE: loop exit
PB: predicated region body
PF: predicated region fallthrough
CT: control target
= control target key end

     0   :  { %v846_v34 = vmov 0.0   ;;  %vm847_vm0 = vmmov 0   ;;  %vm626_vm1 = vcmask 203776   ;;  %s1077_s1 = inlined_call_operand.vmem [shape: bf16[512,128], index: 1, kind: input, shape index: {}]   ;;  %s1078_s0 = inlined_call_operand.vmem [shape: bf16[16,512], index: 0, kind: input, shape index: {}]   ;;  %s1079_s3 = inlined_call_operand.vmem [shape: bf16[128,128], index: 3, kind: input, shape index: {}]   ;;  %s1080_s5 = inlined_call_operand.vmem [shape: bf16[128,25], index: 5, kind: input, shape index: {}]   ;;  %s1081_s2 = inlined_call_operand.vmem [shape: f32[1,128], index: 2, kind: input, shape index: {}]   ;;  %s1082_s4 = inlined_call_operand.vmem [shape: f32[1,128], index: 4, kind: input, shape index: {}]   ;;  %s1083_s6 = inlined_call_operand.vmem [shape: f32[1,25], index: 6, kind: input, shape index: {}]   ;;  %s1084_s7 = inlined_call_operand.vmem [shape: f32[16,25], index: 7, kind: output, shape index: {}]  }
   0x1   :  { %v792_v0 = vld [vmem:[%s1077_s1 + $0x78] sm:$0xff]   ;;  %v796_v4 = vld [vmem:[%s1077_s1 + $0x70] sm:$0xff]   ;;  %v800_v8 = vld [vmem:[%s1077_s1 + $0x68] sm:$0xff]  }
   0x2   :  { %v793_v1 = vld [vmem:[%s1077_s1 + $0xf8] sm:$0xff]   ;;  %688 = vmatprep.subr.bf16.mxu0 %v792_v0  ;;  %v797_v5 = vld [vmem:[%s1077_s1 + $0xf0] sm:$0xff]   ;;  %v801_v9 = vld [vmem:[%s1077_s1 + $0xe8] sm:$0xff]  }
   0x3   :  { %v794_v2 = vld [vmem:[%s1077_s1 + $0x38] sm:$0xff]   ;;  %710 = vmatprep.subr.bf16.mxu1 %v793_v1  ;;  %v798_v6 = vld [vmem:[%s1077_s1 + $0x30] sm:$0xff]   ;;  %v802_v10 = vld [vmem:[%s1077_s1 + $0x28] sm:$0xff]  }
   0x4   :  { %v795_v3 = vld [vmem:[%s1077_s1 + $0xb8] sm:$0xff]   ;;  %689 = vmatpush3.bf16.msra.mxu0 %v794_v2  ;;  %v799_v7 = vld [vmem:[%s1077_s1 + $0xb0] sm:$0xff]   ;;  %v803_v11 = vld [vmem:[%s1077_s1 + $0xa8] sm:$0xff]  }
   0x5   :  { %711 = vmatpush3.bf16.msra.mxu1 %v795_v3  ;;  %690 = vmatprep.subr.bf16.mxu0 %v796_v4  ;;  %v804_v12 = vld [vmem:[%s1077_s1 + $0x60] sm:$0xff]   ;;  %v808_v16 = vld [vmem:[%s1077_s1 + $0x58] sm:$0xff]   ;;  %v812_v20 = vld [vmem:[%s1077_s1 + $0x50] sm:$0xff]  }
   0x6   :  { %712 = vmatprep.subr.bf16.mxu1 %v797_v5  ;;  %v805_v13 = vld [vmem:[%s1077_s1 + $0xe0] sm:$0xff]   ;;  %v809_v17 = vld [vmem:[%s1077_s1 + $0xd8] sm:$0xff]   ;;  %v813_v21 = vld [vmem:[%s1077_s1 + $0xd0] sm:$0xff]  }
   0x7   :  { %v806_v14 = vld [vmem:[%s1077_s1 + $0x20] sm:$0xff]   ;;  %v810_v18 = vld [vmem:[%s1077_s1 + $0x18] sm:$0xff]   ;;  %v814_v22 = vld [vmem:[%s1077_s1 + $0x10] sm:$0xff]  }
   0x8   :  { %691 = vmatpush3.bf16.msra.mxu0 %v798_v6  ;;  %v807_v15 = vld [vmem:[%s1077_s1 + $0xa0] sm:$0xff]   ;;  %v811_v19 = vld [vmem:[%s1077_s1 + $0x98] sm:$0xff]   ;;  %v815_v23 = vld [vmem:[%s1077_s1 + $0x90] sm:$0xff]  }
   0x9   :  { %713 = vmatpush3.bf16.msra.mxu1 %v799_v7  ;;  %692 = vmatprep.subr.bf16.mxu0 %v800_v8  ;;  %v816_v24 = vld [vmem:[%s1077_s1 + $0x48] sm:$0xff]   ;;  %v820_v28 = vld [vmem:[%s1077_s1 + $0x40] sm:$0xff]   ;;  %v830_v37 = vld [vmem:[%s1079_s3 + $0x38] sm:$0xff]  }
   0xa   :  { %714 = vmatprep.subr.bf16.mxu1 %v801_v9  ;;  %v817_v25 = vld [vmem:[%s1077_s1 + $0xc8] sm:$0xff]   ;;  %v821_v29 = vld [vmem:[%s1077_s1 + $0xc0] sm:$0xff]   ;;  %v831_v38 = vld [vmem:[%s1079_s3 + $0x30] sm:$0xff]  }
   0xb   :  { %v818_v26 = vld [vmem:[%s1077_s1 + $0x8] sm:$0xff]   ;;  %v822_v30 = vld [vmem:[%s1077_s1] sm:$0xff]   ;;  %v834_v41 = vld [vmem:[%s1079_s3 + $0x18] sm:$0xff]  }
   0xc   :  { %693 = vmatpush3.bf16.msra.mxu0 %v802_v10  ;;  %v819_v27 = vld [vmem:[%s1077_s1 + $0x88] sm:$0xff]   ;;  %v823_v31 = vld [vmem:[%s1077_s1 + $0x80] sm:$0xff]   ;;  %v835_v42 = vld [vmem:[%s1079_s3 + $0x10] sm:$0xff]  }
   0xd   :  { %715 = vmatpush3.bf16.msra.mxu1 %v803_v11  ;;  %694 = vmatprep.subr.bf16.mxu0 %v804_v12  ;;  %v824_v32 = vld [vmem:[%s1078_s0] ss:$16 sps:$4 sm:$0xff]   ;;  %v826_v33 = vld [vmem:[%s1078_s0 + $0x4] ss:$16 sps:$4 sm:$0xff]   ;;  %v827_v35 = vld [vmem:[%s1078_s0 + $0x8] ss:$16 sps:$4 sm:$0xff]  }
   0xe   :  { %716 = vmatprep.subr.bf16.mxu1 %v805_v13  ;;  %v829_v36 = vld [vmem:[%s1078_s0 + $0xc] ss:$16 sps:$4 sm:$0xff]   ;;  %346 = vmatprep.mubr.bf16.mxu0 %v826_v33  ;;  %v833_v40 = vld [vmem:[%s1079_s3 + $0x20] sm:$0xff]   ;;  %v839_v46 = vld [vmem:[%s1080_s5 + $0x30] sm:$0xff]  }
   0xf   :  { %387 = vmatprep.mubr.bf16.mxu1 %v829_v36  ;;  %v832_v39 = vld [vmem:[%s1079_s3 + $0x28] sm:$0xff]   ;;  %v837_v44 = vld [vmem:[%s1079_s3] sm:$0xff]   ;;  %v838_v45 = vld [vmem:[%s1080_s5 + $0x38] sm:$0xff]  }
  0x10   :  { %695 = vmatpush3.bf16.msra.mxu0 %v806_v14  ;;  %v836_v43 = vld [vmem:[%s1079_s3 + $0x8] sm:$0xff]   ;;  %v841_v48 = vld [vmem:[%s1080_s5 + $0x20] sm:$0xff]   ;;  %v842_v49 = vld [vmem:[%s1080_s5 + $0x18] sm:$0xff]  }
  0x11   :  { %717 = vmatpush3.bf16.msra.mxu1 %v807_v15  ;;  %696 = vmatprep.subr.bf16.mxu0 %v808_v16  ;;  %v840_v47 = vld [vmem:[%s1080_s5 + $0x28] sm:$0xff]   ;;  %v633_v52 = vld [vmem:[%s1081_s2] ss:$0 sm:$0xff]  ;;  %v843_v6 = vld [vmem:[%s1080_s5 + $0x10] sm:$0xff]  }
  0x12   :  { %718 = vmatprep.subr.bf16.mxu1 %v809_v17  ;;  %v844_v7 = vld [vmem:[%s1080_s5 + $0x8] sm:$0xff]   ;;  %v845_v8 = vld [vmem:[%s1080_s5] sm:$0xff]  }
  0x13   :  { %v670_v9 = vld [vmem:[%s1082_s4] ss:$0 sm:$0xff] }
  0x14   :  { %697 = vmatpush3.bf16.msra.mxu0 %v810_v18 }
  0x15   :  { %719 = vmatpush3.bf16.msra.mxu1 %v811_v19  ;;  %698 = vmatprep.subr.bf16.mxu0 %v812_v20  ;;  %v679_v19 = vld [vmem:[%s1083_s6] ss:$0 sm:$0xff] }
  0x16   :  { %720 = vmatprep.subr.bf16.mxu1 %v813_v21 }
  0x18   :  { %699 = vmatpush3.bf16.msra.mxu0 %v814_v22 }
  0x19   :  { %721 = vmatpush3.bf16.msra.mxu1 %v815_v23  ;;  %700 = vmatprep.subr.bf16.mxu0 %v816_v24 }
  0x1a   :  { %722 = vmatprep.subr.bf16.mxu1 %v817_v25 }
  0x1c   :  { %701 = vmatpush3.bf16.msra.mxu0 %v818_v26 }
  0x1d   :  { %723 = vmatpush3.bf16.msra.mxu1 %v819_v27  ;;  %702 = vmatprep.subr.bf16.mxu0 %v820_v28 }
  0x1e   :  { %724 = vmatprep.subr.bf16.mxu1 %v821_v29 }
  0x20   :  { %703 = vmatpush3.bf16.msra.mxu0 %v822_v30 }
  0x21   :  { %725 = vmatpush3.bf16.msra.mxu1 %v823_v31  ;;  %750 = vmatprep.subr.bf16.mxu0 %v846_v34 }
  0x22   :  { %770 = vmatprep.subr.bf16.mxu1 %v846_v34 }
  0x23   :  { %347 = vmatmul.mubr.bf16.vlgmr.msra.gmra.mxu0 %v824_v32 }
  0x24   :  { %388 = vmatmul.mubr.bf16.vlgmr.msra.gmra.mxu1 %v827_v35  ;;  %751 = vmatpush3.bf16.msra.mxu0 %v830_v37 }
  0x25   :  { %752 = vmatprep.subr.bf16.mxu0 %v846_v34  ;;  %766 = vmatprep.mubr.msk.bf16.mxu0 %vm847_vm0, %v846_v34 }
  0x26   :  { %786 = vmatprep.mubr.msk.bf16.mxu1 %vm847_vm0, %v846_v34  ;;  %771 = vmatpush3.bf16.msra.mxu1 %v838_v45 }
  0x27   :  { %772 = vmatprep.subr.bf16.mxu1 %v846_v34 }
  0x28   :  { %753 = vmatpush3.bf16.msra.mxu0 %v831_v38 }
  0x29   :  { %754 = vmatprep.subr.bf16.mxu0 %v846_v34 }
  0x2a   :  { %773 = vmatpush3.bf16.msra.mxu1 %v839_v46 }
  0x2b   :  { %774 = vmatprep.subr.bf16.mxu1 %v846_v34 }
  0x2c   :  { %755 = vmatpush3.bf16.msra.mxu0 %v832_v39 }
  0x2d   :  { %756 = vmatprep.subr.bf16.mxu0 %v846_v34 }
  0x2e   :  { %775 = vmatpush3.bf16.msra.mxu1 %v840_v47 }
  0x2f   :  { %776 = vmatprep.subr.bf16.mxu1 %v846_v34 }
  0x30   :  { %757 = vmatpush3.bf16.msra.mxu0 %v833_v40 }
  0x31   :  { %758 = vmatprep.subr.bf16.mxu0 %v846_v34 }
  0x32   :  { %777 = vmatpush3.bf16.msra.mxu1 %v841_v48 }
  0x33   :  { %778 = vmatprep.subr.bf16.mxu1 %v846_v34 }
  0x34   :  { %759 = vmatpush3.bf16.msra.mxu0 %v834_v41 }
  0x35   :  { %760 = vmatprep.subr.bf16.mxu0 %v846_v34 }
  0x36   :  { %779 = vmatpush3.bf16.msra.mxu1 %v842_v49 }
  0x37   :  { %780 = vmatprep.subr.bf16.mxu1 %v846_v34 }
  0x38   :  { %761 = vmatpush3.bf16.msra.mxu0 %v835_v42 }
  0x39   :  { %762 = vmatprep.subr.bf16.mxu0 %v846_v34 }
  0x3a   :  { %781 = vmatpush3.bf16.msra.mxu1 %v843_v6 }
  0x3b   :  { %782 = vmatprep.subr.bf16.mxu1 %v846_v34 }
  0x3c   :  { %763 = vmatpush3.bf16.msra.mxu0 %v836_v43 }
  0x3d   :  { %764 = vmatprep.subr.bf16.mxu0 %v846_v34 }
  0x3e   :  { %783 = vmatpush3.bf16.msra.mxu1 %v844_v7 }
  0x3f   :  { %784 = vmatprep.subr.bf16.mxu1 %v846_v34 }
  0x40   :  { %765 = vmatpush3.bf16.msra.mxu0 %v837_v44 }
  0x42   :  { %785 = vmatpush3.bf16.msra.mxu1 %v845_v8 }
  0xe3   :  { %v704_v50 = vpop.f32.mrf.mxu0 }
  0xe4   :  { %v726_v51 = vpop.f32.mrf.mxu1 }
  0xe5   :  { %v705_v53 = vpop.f32.mrf.mxu0 }
  0xe6   :  { %v706_v54 = vadd.f32 %v705_v53, %v704_v50  ;;  %v727_v55 = vpop.f32.mrf.mxu1 }
  0xe7   :  { %v707_v56 = vpop.f32.mrf.mxu0  ;;  %v728_v60 = vadd.f32 %v727_v55, %v726_v51 }
  0xe8   :  { %v349_v57 = vadd.f32 %v706_v54, %v633_v52  ;;  %v729_v58 = vpop.f32.mrf.mxu1 }
  0xe9   :  { %v708_v59 = vpop.f32.mrf.mxu0 }
  0xea   :  { %v709_v61 = vadd.f32 %v708_v59, %v707_v56  ;;  %v730_v62 = vpop.f32.mrf.mxu1  ;;  %v390_v63 = vadd.f32 %v728_v60, %v349_v57 }
  0xeb   :  { %v731_v1 = vadd.f32 %v730_v62, %v729_v58 }
  0xec   :  { %v352_v0 = vadd.f32 %v709_v61, %v633_v52  ;;  %v396_v3 = vmax.f32 %v390_v63, 0.0 }
  0xee   :  { %v393_v2 = vadd.f32 %v731_v1, %v352_v0 }
  0xf0   :  { %v397_v4 = vmax.f32 %v393_v2, 0.0 }
  0xf2   :  { %v398_v5 = vpack.c.bf16 %v397_v4, %v396_v3 }
  0xf4   :  { %767 = vmatmul.mubr.bf16.vlgmr.msra.gmra.mxu0 %v398_v5 }
 0x1b4   :  { %v504_v10 = vpop.f32.mrf.mxu0 }
 0x1b5   :  { %v505_v12 = vadd.f32 %v670_v9, %v504_v10 }
 0x1b6   :  { %v768_v11 = vpop.f32.mrf.mxu0 }
 0x1b7   :  { %v511_v16 = vmax.f32 %v505_v12, 0.0 }
 0x1b8   :  { %v507_v13 = vpop.f32.mrf.mxu0 }
 0x1b9   :  { %v508_v14 = vadd.f32 %v670_v9, %v507_v13 }
 0x1ba   :  { %v769_v15 = vpop.f32.mrf.mxu0 }
 0x1bb   :  { %v512_v17 = vmax.f32 %v508_v14, 0.0 }
 0x1bd   :  { %v513_v18 = vpack.c.bf16 %v512_v17, %v511_v16 }
 0x1bf   :  { %787 = vmatmul.mubr.bf16.vlgmr.msra.gmra.mxu1 %v513_v18 }
 0x27f   :  { %v619_v20 = vpop.f32.mrf.mxu1 }
 0x280   :  { %v620_v21 = vadd.f32 %v679_v19, %v619_v20 }
 0x281   :  { %v788_v22 = vpop.f32.mrf.mxu1 }
 0x282   :  { %627 = vst.msk [vmem:[%s1084_s7] sm:$0xff] %vm626_vm1, %v620_v21 }
 0x283   :  { %v622_v23 = vpop.f32.mrf.mxu1 }
 0x284   :  { %v623_v24 = vadd.f32 %v679_v19, %v622_v23 }
 0x285   :  { %v789_v25 = vpop.f32.mrf.mxu1 }
 0x286   :  { %628 = vst.msk [vmem:[%s1084_s7 + $0x8] sm:$0xff] %vm626_vm1, %v623_v24 }

</bundles_post_ra>
